<compile_context>
chip_gen: v5e
topology: v5e:2x2
jax: 0.10.0
libtpu: 0.0.40
codegen_flags: <defaults>
</compile_context>

<pallas_src>
import functools

import jax
import jax.numpy as jnp
from jax.experimental import pallas as pl
from jax.experimental.pallas import tpu as pltpu

# small, deterministic synthetic config (stands in for cfg.MODEL_CONFIG)
CFG = dict(vocab_size=64, d_model=32, nhead=4, num_layers=2, block_size=16)
LN_EPS = 1e-5  # PyTorch LayerNorm default


# ----------------------------- Pallas kernels -----------------------------

def _decoder_layer_kernel(x_ref, mem_ref,
                          sa_wqkv_ref, sa_bqkv_ref, sa_wo_ref, sa_bo_ref,
                          ln1_g_ref, ln1_b_ref,
                          ca_wq_ref, ca_bq_ref, ca_wkv_ref, ca_bkv_ref,
                          ca_wo_ref, ca_bo_ref,
                          ln2_g_ref, ln2_b_ref,
                          w1_ref, b1_ref, w2_ref, b2_ref,
                          ln3_g_ref, ln3_b_ref,
                          o_ref, *, nhead):
    """One full PyTorch TransformerDecoderLayer (post-norm) for one batch row."""
    x = x_ref[0]          # [S, D]
    mem = mem_ref[0]      # [Sm, D]
    S, D = x.shape
    Dh = D // nhead
    scale = 1.0 / (Dh ** 0.5)

    def layernorm(z, g, b):
        mean = jnp.mean(z, axis=-1, keepdims=True)
        var = jnp.mean(jnp.square(z - mean), axis=-1, keepdims=True)
        return (z - mean) * jax.lax.rsqrt(var + LN_EPS) * g + b

    # causal mask built in-kernel (no HBM mask tensor): keep where row >= col
    row = jax.lax.broadcasted_iota(jnp.int32, (S, S), 0)
    col = jax.lax.broadcasted_iota(jnp.int32, (S, S), 1)
    causal_keep = row >= col

    def mha(q_in, k_in, v_in, wo_ref, bo_ref, mask):
        # q_in: [Sq, D]; k_in/v_in: [Sk, D] (already projected)
        outs = []
        for h in range(nhead):          # static unrolled loop, 2-D ops only
            lo = h * Dh
            qh = q_in[:, lo:lo + Dh]
            kh = k_in[:, lo:lo + Dh]
            vh = v_in[:, lo:lo + Dh]
            s = jax.lax.dot_general(qh, kh, (((1,), (1,)), ((), ())),
                                    preferred_element_type=jnp.float32) * scale
            if mask is not None:
                s = jnp.where(mask, s, -jnp.inf)
            s = s - jnp.max(s, axis=-1, keepdims=True)
            p = jnp.exp(s)
            p = p * pl.reciprocal(jnp.sum(p, axis=-1, keepdims=True), approx=True)
            outs.append(jnp.dot(p, vh, preferred_element_type=jnp.float32))
        o = jnp.concatenate(outs, axis=-1)             # [Sq, D]
        return jnp.dot(o, wo_ref[...],
                       preferred_element_type=jnp.float32) + bo_ref[...]

    # ---- self-attention (fused QKV projection) ----
    qkv = jnp.dot(x, sa_wqkv_ref[...],
                  preferred_element_type=jnp.float32) + sa_bqkv_ref[...]
    q, k, v = qkv[:, :D], qkv[:, D:2 * D], qkv[:, 2 * D:]
    sa = mha(q, k, v, sa_wo_ref, sa_bo_ref, causal_keep)
    z = layernorm(x + sa, ln1_g_ref[...], ln1_b_ref[...])

    # ---- cross-attention over memory (fused KV projection, no mask) ----
    cq = jnp.dot(z, ca_wq_ref[...],
                 preferred_element_type=jnp.float32) + ca_bq_ref[...]
    ckv = jnp.dot(mem, ca_wkv_ref[...],
                  preferred_element_type=jnp.float32) + ca_bkv_ref[...]
    ck, cv = ckv[:, :D], ckv[:, D:]
    ca = mha(cq, ck, cv, ca_wo_ref, ca_bo_ref, None)
    z = layernorm(z + ca, ln2_g_ref[...], ln2_b_ref[...])

    # ---- feed-forward (ReLU) ----
    h = jnp.dot(z, w1_ref[...], preferred_element_type=jnp.float32) + b1_ref[...]
    h = jnp.maximum(h, 0.0)
    ff = jnp.dot(h, w2_ref[...], preferred_element_type=jnp.float32) + b2_ref[...]
    z = layernorm(z + ff, ln3_g_ref[...], ln3_b_ref[...])

    o_ref[0] = z


def decoder_layer(x, memory, p, nhead):
    """x: [B,S,D], memory: [B,Sm,D] -> [B,S,D]; one pallas_call for the layer."""
    B, S, D = x.shape
    Sm = memory.shape[1]
    F = p['w1'].shape[1]
    kern = functools.partial(_decoder_layer_kernel, nhead=nhead)

    def full(shape):
        return pl.BlockSpec(shape, lambda b: (0, 0))

    return pl.pallas_call(
        kern,
        out_shape=jax.ShapeDtypeStruct((B, S, D), jnp.float32),
        grid=(B,),
        in_specs=[
            pl.BlockSpec((1, S, D), lambda b: (b, 0, 0)),     # x
            pl.BlockSpec((1, Sm, D), lambda b: (b, 0, 0)),    # memory
            full((D, 3 * D)), full((1, 3 * D)),               # sa_wqkv, sa_bqkv
            full((D, D)), full((1, D)),                       # sa_wo, sa_bo
            full((1, D)), full((1, D)),                       # ln1 g,b
            full((D, D)), full((1, D)),                       # ca_wq, ca_bq
            full((D, 2 * D)), full((1, 2 * D)),               # ca_wkv, ca_bkv
            full((D, D)), full((1, D)),                       # ca_wo, ca_bo
            full((1, D)), full((1, D)),                       # ln2 g,b
            full((D, F)), full((1, F)),                       # w1, b1
            full((F, D)), full((1, D)),                       # w2, b2
            full((1, D)), full((1, D)),                       # ln3 g,b
        ],
        out_specs=pl.BlockSpec((1, S, D), lambda b: (b, 0, 0)),
        compiler_params=pltpu.CompilerParams(
            dimension_semantics=("parallel",)),               # lets v7x use both TCs
    )(x, memory,
      p['sa_wqkv'], p['sa_bqkv'].reshape(1, -1),
      p['sa_wo'], p['sa_bo'].reshape(1, -1),
      p['ln1_g'].reshape(1, -1), p['ln1_b'].reshape(1, -1),
      p['ca_wq'], p['ca_bq'].reshape(1, -1),
      p['ca_wkv'], p['ca_bkv'].reshape(1, -1),
      p['ca_wo'], p['ca_bo'].reshape(1, -1),
      p['ln2_g'].reshape(1, -1), p['ln2_b'].reshape(1, -1),
      p['w1'], p['b1'].reshape(1, -1),
      p['w2'], p['b2'].reshape(1, -1),
      p['ln3_g'].reshape(1, -1), p['ln3_b'].reshape(1, -1))


def _head_kernel(x_ref, w_ref, b_ref, o_ref):
    o_ref[...] = (jnp.dot(x_ref[...], w_ref[...],
                          preferred_element_type=jnp.float32) + b_ref[...])


def lm_head(x_flat, w_pad, b_pad, rows_per_block=8):
    """x_flat: [M, D] @ w_pad: [D, Vp] (Vp multiple of 128, lane-dense stores)."""
    M, D = x_flat.shape
    Vp = w_pad.shape[1]
    return pl.pallas_call(
        _head_kernel,
        out_shape=jax.ShapeDtypeStruct((M, Vp), jnp.float32),
        grid=(M // rows_per_block,),
        in_specs=[pl.BlockSpec((rows_per_block, D), lambda i: (i, 0)),
                  pl.BlockSpec((D, Vp), lambda i: (0, 0)),
                  pl.BlockSpec((1, Vp), lambda i: (0, 0))],
        out_specs=pl.BlockSpec((rows_per_block, Vp), lambda i: (i, 0)),
        compiler_params=pltpu.CompilerParams(
            dimension_semantics=("parallel",)),
    )(x_flat, w_pad, b_pad)


# ----------------------------- model glue ---------------------------------

def minigpt_forward(tokens, memory, params, cfg):
    B, S = tokens.shape
    D = cfg['d_model']
    V = cfg['vocab_size']
    # embedding gather + positional add stay in plain JAX (single fused XLA op)
    tok = jnp.take(params['embed'], tokens, axis=0)           # [B, S, D]
    pos = params['pos_embed'][:S]                             # [S, D]
    x = tok + pos[None, :, :]

    for layer_p in params['layers']:
        x = decoder_layer(x, memory, layer_p, cfg['nhead'])

    # pad vocab to 128 lanes for the head matmul (unmasked vst), slice back after
    Vp = ((V + 127) // 128) * 128
    w_pad = jnp.zeros((D, Vp), jnp.float32).at[:, :V].set(params['fc_w'])
    b_pad = jnp.zeros((1, Vp), jnp.float32).at[:, :V].set(params['fc_b'])
    logits = lm_head(x.reshape(B * S, D), w_pad, b_pad)
    return logits[:, :V].reshape(B, S, V)


def init_params(key, cfg):
    V, D, H, L = cfg['vocab_size'], cfg['d_model'], cfg['nhead'], cfg['num_layers']
    F = 4 * D
    keys = jax.random.split(key, 3 + L)

    def nrm(k, shape):
        return jax.random.normal(k, shape, jnp.float32) * 0.02

    params = {
        'embed': nrm(keys[0], (V, D)),
        'pos_embed': nrm(keys[1], (cfg['block_size'], D)),
        'fc_w': nrm(keys[2], (D, V)),
        'fc_b': jnp.zeros((V,), jnp.float32),
        'layers': [],
    }
    for l in range(L):
        lk = jax.random.split(keys[3 + l], 7)
        layer = {
            'sa_wqkv': nrm(lk[0], (D, 3 * D)),     # fused Q,K,V projection
            'sa_bqkv': jnp.zeros((3 * D,), jnp.float32),
            'sa_wo': nrm(lk[1], (D, D)),
            'sa_bo': jnp.zeros((D,), jnp.float32),
            'ca_wq': nrm(lk[2], (D, D)),
            'ca_bq': jnp.zeros((D,), jnp.float32),
            'ca_wkv': nrm(lk[3], (D, 2 * D)),      # fused K,V projection
            'ca_bkv': jnp.zeros((2 * D,), jnp.float32),
            'ca_wo': nrm(lk[4], (D, D)),
            'ca_bo': jnp.zeros((D,), jnp.float32),
            'w1': nrm(lk[5], (D, F)),
            'b1': jnp.zeros((F,), jnp.float32),
            'w2': nrm(lk[6], (F, D)),
            'b2': jnp.zeros((D,), jnp.float32),
        }
        for n in ('ln1', 'ln2', 'ln3'):
            layer[n + '_g'] = jnp.ones((D,), jnp.float32)
            layer[n + '_b'] = jnp.zeros((D,), jnp.float32)
        params['layers'].append(layer)
    return params


if __name__ == "__main__":
    cfg = CFG
    key = jax.random.PRNGKey(0)
    k_params, k_tok, k_mem = jax.random.split(key, 3)
    params = init_params(k_params, cfg)

    B, S, Sm = 2, 8, 8
    tokens = jax.random.randint(k_tok, (B, S), 0, cfg['vocab_size'])
    memory = jax.random.normal(k_mem, (B, Sm, cfg['d_model']), jnp.float32)

    logits = minigpt_forward(tokens, memory, params, cfg)
    logits = jax.block_until_ready(logits)

    assert logits.shape == (B, S, cfg['vocab_size'])
    assert bool(jnp.all(jnp.isfinite(logits)))
    print("KERNEL_OK")
</pallas_src>

<mosaic_0001>
module attributes {stable_mosaic.version = 11 : i64} {
  func.func @_decoder_layer_kernel(%arg0: i32, %arg1: memref<1x8x32xf32, #tpu.memory_space<vmem>>, %arg2: memref<1x8x32xf32, #tpu.memory_space<vmem>>, %arg3: memref<32x96xf32, #tpu.memory_space<vmem>>, %arg4: memref<1x96xf32, #tpu.memory_space<vmem>>, %arg5: memref<32x32xf32, #tpu.memory_space<vmem>>, %arg6: memref<1x32xf32, #tpu.memory_space<vmem>>, %arg7: memref<1x32xf32, #tpu.memory_space<vmem>>, %arg8: memref<1x32xf32, #tpu.memory_space<vmem>>, %arg9: memref<32x32xf32, #tpu.memory_space<vmem>>, %arg10: memref<1x32xf32, #tpu.memory_space<vmem>>, %arg11: memref<32x64xf32, #tpu.memory_space<vmem>>, %arg12: memref<1x64xf32, #tpu.memory_space<vmem>>, %arg13: memref<32x32xf32, #tpu.memory_space<vmem>>, %arg14: memref<1x32xf32, #tpu.memory_space<vmem>>, %arg15: memref<1x32xf32, #tpu.memory_space<vmem>>, %arg16: memref<1x32xf32, #tpu.memory_space<vmem>>, %arg17: memref<32x128xf32, #tpu.memory_space<vmem>>, %arg18: memref<1x128xf32, #tpu.memory_space<vmem>>, %arg19: memref<128x32xf32, #tpu.memory_space<vmem>>, %arg20: memref<1x32xf32, #tpu.memory_space<vmem>>, %arg21: memref<1x32xf32, #tpu.memory_space<vmem>>, %arg22: memref<1x32xf32, #tpu.memory_space<vmem>>, %arg23: memref<1x8x32xf32, #tpu.memory_space<vmem>>) attributes {dimension_semantics = [#tpu.dimension_semantics<parallel>], iteration_bounds = array<i64: 2>, scalar_prefetch = 0 : i64, scratch_operands = 0 : i64, tpu.core_type = #tpu.core_type<tc>, window_params = [{transform_indices = @transform_0, window_bounds = array<i64: 1, 8, 32>}, {transform_indices = @transform_1, window_bounds = array<i64: 1, 8, 32>}, {pipeline_mode = #tpu.pipeline_mode<synchronous>, transform_indices = @transform_2, window_bounds = array<i64: 32, 96>}, {pipeline_mode = #tpu.pipeline_mode<synchronous>, transform_indices = @transform_3, window_bounds = array<i64: 1, 96>}, {pipeline_mode = #tpu.pipeline_mode<synchronous>, transform_indices = @transform_4, window_bounds = array<i64: 32, 32>}, {pipeline_mode = #tpu.pipeline_mode<synchronous>, transform_indices = @transform_5, window_bounds = array<i64: 1, 32>}, {pipeline_mode = #tpu.pipeline_mode<synchronous>, transform_indices = @transform_6, window_bounds = array<i64: 1, 32>}, {pipeline_mode = #tpu.pipeline_mode<synchronous>, transform_indices = @transform_7, window_bounds = array<i64: 1, 32>}, {pipeline_mode = #tpu.pipeline_mode<synchronous>, transform_indices = @transform_8, window_bounds = array<i64: 32, 32>}, {pipeline_mode = #tpu.pipeline_mode<synchronous>, transform_indices = @transform_9, window_bounds = array<i64: 1, 32>}, {pipeline_mode = #tpu.pipeline_mode<synchronous>, transform_indices = @transform_10, window_bounds = array<i64: 32, 64>}, {pipeline_mode = #tpu.pipeline_mode<synchronous>, transform_indices = @transform_11, window_bounds = array<i64: 1, 64>}, {pipeline_mode = #tpu.pipeline_mode<synchronous>, transform_indices = @transform_12, window_bounds = array<i64: 32, 32>}, {pipeline_mode = #tpu.pipeline_mode<synchronous>, transform_indices = @transform_13, window_bounds = array<i64: 1, 32>}, {pipeline_mode = #tpu.pipeline_mode<synchronous>, transform_indices = @transform_14, window_bounds = array<i64: 1, 32>}, {pipeline_mode = #tpu.pipeline_mode<synchronous>, transform_indices = @transform_15, window_bounds = array<i64: 1, 32>}, {pipeline_mode = #tpu.pipeline_mode<synchronous>, transform_indices = @transform_16, window_bounds = array<i64: 32, 128>}, {pipeline_mode = #tpu.pipeline_mode<synchronous>, transform_indices = @transform_17, window_bounds = array<i64: 1, 128>}, {pipeline_mode = #tpu.pipeline_mode<synchronous>, transform_indices = @transform_18, window_bounds = array<i64: 128, 32>}, {pipeline_mode = #tpu.pipeline_mode<synchronous>, transform_indices = @transform_19, window_bounds = array<i64: 1, 32>}, {pipeline_mode = #tpu.pipeline_mode<synchronous>, transform_indices = @transform_20, window_bounds = array<i64: 1, 32>}, {pipeline_mode = #tpu.pipeline_mode<synchronous>, transform_indices = @transform_21, window_bounds = array<i64: 1, 32>}, {transform_indices = @transform_22, window_bounds = array<i64: 1, 8, 32>}]} {
    %c0 = arith.constant 0 : index
    %c0_0 = arith.constant 0 : index
    %c0_1 = arith.constant 0 : index
    %0 = vector.load %arg1[%c0, %c0_0, %c0_1] : memref<1x8x32xf32, #tpu.memory_space<vmem>>, vector<1x8x32xf32>
    %1 = vector.shape_cast %0 : vector<1x8x32xf32> to vector<8x32xf32>
    %c0_2 = arith.constant 0 : index
    %c0_3 = arith.constant 0 : index
    %c0_4 = arith.constant 0 : index
    %2 = vector.load %arg2[%c0_2, %c0_3, %c0_4] : memref<1x8x32xf32, #tpu.memory_space<vmem>>, vector<1x8x32xf32>
    %3 = vector.shape_cast %2 : vector<1x8x32xf32> to vector<8x32xf32>
    %4 = tpu.iota {dimensions = array<i32: 0>} : vector<8x8xi32>
    %5 = tpu.iota {dimensions = array<i32: 1>} : vector<8x8xi32>
    %6 = arith.cmpi sge, %4, %5 : vector<8x8xi32>
    %c0_5 = arith.constant 0 : index
    %c0_6 = arith.constant 0 : index
    %7 = vector.load %arg3[%c0_5, %c0_6] : memref<32x96xf32, #tpu.memory_space<vmem>>, vector<32x96xf32>
    %cst = arith.constant dense<0.000000e+00> : vector<8x96xf32>
    %8 = tpu.matmul %1, %7, %cst {dimension_numbers = #tpu.dot_dimension_numbers<[1], [0], [0], [1], [0, 0, 1, 1], [], []>} : vector<8x32xf32>, vector<32x96xf32>, vector<8x96xf32> -> vector<8x96xf32>
    %c0_7 = arith.constant 0 : index
    %c0_8 = arith.constant 0 : index
    %9 = vector.load %arg4[%c0_7, %c0_8] : memref<1x96xf32, #tpu.memory_space<vmem>>, vector<1x96xf32>
    %10 = vector.broadcast %9 : vector<1x96xf32> to vector<8x96xf32>
    %11 = arith.addf %8, %10 : vector<8x96xf32>
    %12 = vector.extract_strided_slice %11 {offsets = [0, 0], sizes = [8, 32], strides = [1, 1]} : vector<8x96xf32> to vector<8x32xf32>
    %13 = vector.extract_strided_slice %11 {offsets = [0, 32], sizes = [8, 32], strides = [1, 1]} : vector<8x96xf32> to vector<8x32xf32>
    %14 = vector.extract_strided_slice %11 {offsets = [0, 64], sizes = [8, 32], strides = [1, 1]} : vector<8x96xf32> to vector<8x32xf32>
    %15 = vector.extract_strided_slice %12 {offsets = [0, 0], sizes = [8, 8], strides = [1, 1]} : vector<8x32xf32> to vector<8x8xf32>
    %16 = vector.extract_strided_slice %13 {offsets = [0, 0], sizes = [8, 8], strides = [1, 1]} : vector<8x32xf32> to vector<8x8xf32>
    %17 = vector.extract_strided_slice %14 {offsets = [0, 0], sizes = [8, 8], strides = [1, 1]} : vector<8x32xf32> to vector<8x8xf32>
    %cst_9 = arith.constant dense<0.000000e+00> : vector<8x8xf32>
    %18 = tpu.matmul %15, %16, %cst_9 {dimension_numbers = #tpu.dot_dimension_numbers<[1], [1], [0], [0], [0, 0, 1, 0], [], []>} : vector<8x8xf32>, vector<8x8xf32>, vector<8x8xf32> -> vector<8x8xf32>
    %cst_10 = arith.constant 0.353553385 : f32
    %19 = vector.broadcast %cst_10 : f32 to vector<8x8xf32>
    %20 = arith.mulf %18, %19 : vector<8x8xf32>
    %cst_11 = arith.constant 0xFF800000 : f32
    %21 = vector.broadcast %cst_11 : f32 to vector<8x8xf32>
    %22 = arith.select %6, %20, %21 : vector<8x8xi1>, vector<8x8xf32>
    %cst_12 = arith.constant dense<0xFF800000> : vector<8xf32>
    %23 = vector.multi_reduction <maximumf>, %22, %cst_12 [1] : vector<8x8xf32> to vector<8xf32>
    %24 = vector.shape_cast %23 : vector<8xf32> to vector<8x1xf32>
    %25 = vector.broadcast %24 : vector<8x1xf32> to vector<8x8xf32>
    %26 = arith.subf %22, %25 : vector<8x8xf32>
    %27 = math.exp %26 : vector<8x8xf32>
    %cst_13 = arith.constant dense<0.000000e+00> : vector<8xf32>
    %28 = vector.multi_reduction <add>, %27, %cst_13 [1] : vector<8x8xf32> to vector<8xf32>
    %29 = vector.shape_cast %28 : vector<8xf32> to vector<8x1xf32>
    %30 = tpu.reciprocal %29 {approx = true} : vector<8x1xf32> -> vector<8x1xf32>
    %31 = vector.broadcast %30 : vector<8x1xf32> to vector<8x8xf32>
    %32 = arith.mulf %27, %31 : vector<8x8xf32>
    %cst_14 = arith.constant dense<0.000000e+00> : vector<8x8xf32>
    %33 = tpu.matmul %32, %17, %cst_14 {dimension_numbers = #tpu.dot_dimension_numbers<[1], [0], [0], [1], [0, 0, 1, 1], [], []>} : vector<8x8xf32>, vector<8x8xf32>, vector<8x8xf32> -> vector<8x8xf32>
    %34 = vector.extract_strided_slice %12 {offsets = [0, 8], sizes = [8, 8], strides = [1, 1]} : vector<8x32xf32> to vector<8x8xf32>
    %35 = vector.extract_strided_slice %13 {offsets = [0, 8], sizes = [8, 8], strides = [1, 1]} : vector<8x32xf32> to vector<8x8xf32>
    %36 = vector.extract_strided_slice %14 {offsets = [0, 8], sizes = [8, 8], strides = [1, 1]} : vector<8x32xf32> to vector<8x8xf32>
    %cst_15 = arith.constant dense<0.000000e+00> : vector<8x8xf32>
    %37 = tpu.matmul %34, %35, %cst_15 {dimension_numbers = #tpu.dot_dimension_numbers<[1], [1], [0], [0], [0, 0, 1, 0], [], []>} : vector<8x8xf32>, vector<8x8xf32>, vector<8x8xf32> -> vector<8x8xf32>
    %cst_16 = arith.constant 0.353553385 : f32
    %38 = vector.broadcast %cst_16 : f32 to vector<8x8xf32>
    %39 = arith.mulf %37, %38 : vector<8x8xf32>
    %cst_17 = arith.constant 0xFF800000 : f32
    %40 = vector.broadcast %cst_17 : f32 to vector<8x8xf32>
    %41 = arith.select %6, %39, %40 : vector<8x8xi1>, vector<8x8xf32>
    %cst_18 = arith.constant dense<0xFF800000> : vector<8xf32>
    %42 = vector.multi_reduction <maximumf>, %41, %cst_18 [1] : vector<8x8xf32> to vector<8xf32>
    %43 = vector.shape_cast %42 : vector<8xf32> to vector<8x1xf32>
    %44 = vector.broadcast %43 : vector<8x1xf32> to vector<8x8xf32>
    %45 = arith.subf %41, %44 : vector<8x8xf32>
    %46 = math.exp %45 : vector<8x8xf32>
    %cst_19 = arith.constant dense<0.000000e+00> : vector<8xf32>
    %47 = vector.multi_reduction <add>, %46, %cst_19 [1] : vector<8x8xf32> to vector<8xf32>
    %48 = vector.shape_cast %47 : vector<8xf32> to vector<8x1xf32>
    %49 = tpu.reciprocal %48 {approx = true} : vector<8x1xf32> -> vector<8x1xf32>
    %50 = vector.broadcast %49 : vector<8x1xf32> to vector<8x8xf32>
    %51 = arith.mulf %46, %50 : vector<8x8xf32>
    %cst_20 = arith.constant dense<0.000000e+00> : vector<8x8xf32>
    %52 = tpu.matmul %51, %36, %cst_20 {dimension_numbers = #tpu.dot_dimension_numbers<[1], [0], [0], [1], [0, 0, 1, 1], [], []>} : vector<8x8xf32>, vector<8x8xf32>, vector<8x8xf32> -> vector<8x8xf32>
    %53 = vector.extract_strided_slice %12 {offsets = [0, 16], sizes = [8, 8], strides = [1, 1]} : vector<8x32xf32> to vector<8x8xf32>
    %54 = vector.extract_strided_slice %13 {offsets = [0, 16], sizes = [8, 8], strides = [1, 1]} : vector<8x32xf32> to vector<8x8xf32>
    %55 = vector.extract_strided_slice %14 {offsets = [0, 16], sizes = [8, 8], strides = [1, 1]} : vector<8x32xf32> to vector<8x8xf32>
    %cst_21 = arith.constant dense<0.000000e+00> : vector<8x8xf32>
    %56 = tpu.matmul %53, %54, %cst_21 {dimension_numbers = #tpu.dot_dimension_numbers<[1], [1], [0], [0], [0, 0, 1, 0], [], []>} : vector<8x8xf32>, vector<8x8xf32>, vector<8x8xf32> -> vector<8x8xf32>
    %cst_22 = arith.constant 0.353553385 : f32
    %57 = vector.broadcast %cst_22 : f32 to vector<8x8xf32>
    %58 = arith.mulf %56, %57 : vector<8x8xf32>
    %cst_23 = arith.constant 0xFF800000 : f32
    %59 = vector.broadcast %cst_23 : f32 to vector<8x8xf32>
    %60 = arith.select %6, %58, %59 : vector<8x8xi1>, vector<8x8xf32>
    %cst_24 = arith.constant dense<0xFF800000> : vector<8xf32>
    %61 = vector.multi_reduction <maximumf>, %60, %cst_24 [1] : vector<8x8xf32> to vector<8xf32>
    %62 = vector.shape_cast %61 : vector<8xf32> to vector<8x1xf32>
    %63 = vector.broadcast %62 : vector<8x1xf32> to vector<8x8xf32>
    %64 = arith.subf %60, %63 : vector<8x8xf32>
    %65 = math.exp %64 : vector<8x8xf32>
    %cst_25 = arith.constant dense<0.000000e+00> : vector<8xf32>
    %66 = vector.multi_reduction <add>, %65, %cst_25 [1] : vector<8x8xf32> to vector<8xf32>
    %67 = vector.shape_cast %66 : vector<8xf32> to vector<8x1xf32>
    %68 = tpu.reciprocal %67 {approx = true} : vector<8x1xf32> -> vector<8x1xf32>
    %69 = vector.broadcast %68 : vector<8x1xf32> to vector<8x8xf32>
    %70 = arith.mulf %65, %69 : vector<8x8xf32>
    %cst_26 = arith.constant dense<0.000000e+00> : vector<8x8xf32>
    %71 = tpu.matmul %70, %55, %cst_26 {dimension_numbers = #tpu.dot_dimension_numbers<[1], [0], [0], [1], [0, 0, 1, 1], [], []>} : vector<8x8xf32>, vector<8x8xf32>, vector<8x8xf32> -> vector<8x8xf32>
    %72 = vector.extract_strided_slice %12 {offsets = [0, 24], sizes = [8, 8], strides = [1, 1]} : vector<8x32xf32> to vector<8x8xf32>
    %73 = vector.extract_strided_slice %13 {offsets = [0, 24], sizes = [8, 8], strides = [1, 1]} : vector<8x32xf32> to vector<8x8xf32>
    %74 = vector.extract_strided_slice %14 {offsets = [0, 24], sizes = [8, 8], strides = [1, 1]} : vector<8x32xf32> to vector<8x8xf32>
    %cst_27 = arith.constant dense<0.000000e+00> : vector<8x8xf32>
    %75 = tpu.matmul %72, %73, %cst_27 {dimension_numbers = #tpu.dot_dimension_numbers<[1], [1], [0], [0], [0, 0, 1, 0], [], []>} : vector<8x8xf32>, vector<8x8xf32>, vector<8x8xf32> -> vector<8x8xf32>
    %cst_28 = arith.constant 0.353553385 : f32
    %76 = vector.broadcast %cst_28 : f32 to vector<8x8xf32>
    %77 = arith.mulf %75, %76 : vector<8x8xf32>
    %cst_29 = arith.constant 0xFF800000 : f32
    %78 = vector.broadcast %cst_29 : f32 to vector<8x8xf32>
    %79 = arith.select %6, %77, %78 : vector<8x8xi1>, vector<8x8xf32>
    %cst_30 = arith.constant dense<0xFF800000> : vector<8xf32>
    %80 = vector.multi_reduction <maximumf>, %79, %cst_30 [1] : vector<8x8xf32> to vector<8xf32>
    %81 = vector.shape_cast %80 : vector<8xf32> to vector<8x1xf32>
    %82 = vector.broadcast %81 : vector<8x1xf32> to vector<8x8xf32>
    %83 = arith.subf %79, %82 : vector<8x8xf32>
    %84 = math.exp %83 : vector<8x8xf32>
    %cst_31 = arith.constant dense<0.000000e+00> : vector<8xf32>
    %85 = vector.multi_reduction <add>, %84, %cst_31 [1] : vector<8x8xf32> to vector<8xf32>
    %86 = vector.shape_cast %85 : vector<8xf32> to vector<8x1xf32>
    %87 = tpu.reciprocal %86 {approx = true} : vector<8x1xf32> -> vector<8x1xf32>
    %88 = vector.broadcast %87 : vector<8x1xf32> to vector<8x8xf32>
    %89 = arith.mulf %84, %88 : vector<8x8xf32>
    %cst_32 = arith.constant dense<0.000000e+00> : vector<8x8xf32>
    %90 = tpu.matmul %89, %74, %cst_32 {dimension_numbers = #tpu.dot_dimension_numbers<[1], [0], [0], [1], [0, 0, 1, 1], [], []>} : vector<8x8xf32>, vector<8x8xf32>, vector<8x8xf32> -> vector<8x8xf32>
    %91 = tpu.concatenate %33, %52, %71, %90 in 1 : vector<8x8xf32>, vector<8x8xf32>, vector<8x8xf32>, vector<8x8xf32> -> vector<8x32xf32>
    %c0_33 = arith.constant 0 : index
    %c0_34 = arith.constant 0 : index
    %92 = vector.load %arg5[%c0_33, %c0_34] : memref<32x32xf32, #tpu.memory_space<vmem>>, vector<32x32xf32>
    %cst_35 = arith.constant dense<0.000000e+00> : vector<8x32xf32>
    %93 = tpu.matmul %91, %92, %cst_35 {dimension_numbers = #tpu.dot_dimension_numbers<[1], [0], [0], [1], [0, 0, 1, 1], [], []>} : vector<8x32xf32>, vector<32x32xf32>, vector<8x32xf32> -> vector<8x32xf32>
    %c0_36 = arith.constant 0 : index
    %c0_37 = arith.constant 0 : index
    %94 = vector.load %arg6[%c0_36, %c0_37] : memref<1x32xf32, #tpu.memory_space<vmem>>, vector<1x32xf32>
    %95 = vector.broadcast %94 : vector<1x32xf32> to vector<8x32xf32>
    %96 = arith.addf %93, %95 : vector<8x32xf32>
    %97 = arith.addf %1, %96 : vector<8x32xf32>
    %c0_38 = arith.constant 0 : index
    %c0_39 = arith.constant 0 : index
    %98 = vector.load %arg7[%c0_38, %c0_39] : memref<1x32xf32, #tpu.memory_space<vmem>>, vector<1x32xf32>
    %c0_40 = arith.constant 0 : index
    %c0_41 = arith.constant 0 : index
    %99 = vector.load %arg8[%c0_40, %c0_41] : memref<1x32xf32, #tpu.memory_space<vmem>>, vector<1x32xf32>
    %cst_42 = arith.constant dense<0.000000e+00> : vector<8xf32>
    %100 = vector.multi_reduction <add>, %97, %cst_42 [1] : vector<8x32xf32> to vector<8xf32>
    %101 = vector.shape_cast %100 : vector<8xf32> to vector<8x1xf32>
    %cst_43 = arith.constant 3.200000e+01 : f32
    %102 = vector.broadcast %cst_43 : f32 to vector<8x1xf32>
    %103 = arith.divf %101, %102 : vector<8x1xf32>
    %104 = vector.broadcast %103 : vector<8x1xf32> to vector<8x32xf32>
    %105 = arith.subf %97, %104 : vector<8x32xf32>
    %106 = arith.mulf %105, %105 : vector<8x32xf32>
    %cst_44 = arith.constant dense<0.000000e+00> : vector<8xf32>
    %107 = vector.multi_reduction <add>, %106, %cst_44 [1] : vector<8x32xf32> to vector<8xf32>
    %108 = vector.shape_cast %107 : vector<8xf32> to vector<8x1xf32>
    %cst_45 = arith.constant 3.200000e+01 : f32
    %109 = vector.broadcast %cst_45 : f32 to vector<8x1xf32>
    %110 = arith.divf %108, %109 : vector<8x1xf32>
    %111 = vector.broadcast %103 : vector<8x1xf32> to vector<8x32xf32>
    %112 = arith.subf %97, %111 : vector<8x32xf32>
    %cst_46 = arith.constant 9.99999974E-6 : f32
    %113 = vector.broadcast %cst_46 : f32 to vector<8x1xf32>
    %114 = arith.addf %110, %113 : vector<8x1xf32>
    %115 = math.rsqrt %114 : vector<8x1xf32>
    %116 = vector.broadcast %115 : vector<8x1xf32> to vector<8x32xf32>
    %117 = arith.mulf %112, %116 : vector<8x32xf32>
    %118 = vector.broadcast %98 : vector<1x32xf32> to vector<8x32xf32>
    %119 = arith.mulf %117, %118 : vector<8x32xf32>
    %120 = vector.broadcast %99 : vector<1x32xf32> to vector<8x32xf32>
    %121 = arith.addf %119, %120 : vector<8x32xf32>
    %c0_47 = arith.constant 0 : index
    %c0_48 = arith.constant 0 : index
    %122 = vector.load %arg9[%c0_47, %c0_48] : memref<32x32xf32, #tpu.memory_space<vmem>>, vector<32x32xf32>
    %cst_49 = arith.constant dense<0.000000e+00> : vector<8x32xf32>
    %123 = tpu.matmul %121, %122, %cst_49 {dimension_numbers = #tpu.dot_dimension_numbers<[1], [0], [0], [1], [0, 0, 1, 1], [], []>} : vector<8x32xf32>, vector<32x32xf32>, vector<8x32xf32> -> vector<8x32xf32>
    %c0_50 = arith.constant 0 : index
    %c0_51 = arith.constant 0 : index
    %124 = vector.load %arg10[%c0_50, %c0_51] : memref<1x32xf32, #tpu.memory_space<vmem>>, vector<1x32xf32>
    %125 = vector.broadcast %124 : vector<1x32xf32> to vector<8x32xf32>
    %126 = arith.addf %123, %125 : vector<8x32xf32>
    %c0_52 = arith.constant 0 : index
    %c0_53 = arith.constant 0 : index
    %127 = vector.load %arg11[%c0_52, %c0_53] : memref<32x64xf32, #tpu.memory_space<vmem>>, vector<32x64xf32>
    %cst_54 = arith.constant dense<0.000000e+00> : vector<8x64xf32>
    %128 = tpu.matmul %3, %127, %cst_54 {dimension_numbers = #tpu.dot_dimension_numbers<[1], [0], [0], [1], [0, 0, 1, 1], [], []>} : vector<8x32xf32>, vector<32x64xf32>, vector<8x64xf32> -> vector<8x64xf32>
    %c0_55 = arith.constant 0 : index
    %c0_56 = arith.constant 0 : index
    %129 = vector.load %arg12[%c0_55, %c0_56] : memref<1x64xf32, #tpu.memory_space<vmem>>, vector<1x64xf32>
    %130 = vector.broadcast %129 : vector<1x64xf32> to vector<8x64xf32>
    %131 = arith.addf %128, %130 : vector<8x64xf32>
    %132 = vector.extract_strided_slice %131 {offsets = [0, 0], sizes = [8, 32], strides = [1, 1]} : vector<8x64xf32> to vector<8x32xf32>
    %133 = vector.extract_strided_slice %131 {offsets = [0, 32], sizes = [8, 32], strides = [1, 1]} : vector<8x64xf32> to vector<8x32xf32>
    %134 = vector.extract_strided_slice %126 {offsets = [0, 0], sizes = [8, 8], strides = [1, 1]} : vector<8x32xf32> to vector<8x8xf32>
    %135 = vector.extract_strided_slice %132 {offsets = [0, 0], sizes = [8, 8], strides = [1, 1]} : vector<8x32xf32> to vector<8x8xf32>
    %136 = vector.extract_strided_slice %133 {offsets = [0, 0], sizes = [8, 8], strides = [1, 1]} : vector<8x32xf32> to vector<8x8xf32>
    %cst_57 = arith.constant dense<0.000000e+00> : vector<8x8xf32>
    %137 = tpu.matmul %134, %135, %cst_57 {dimension_numbers = #tpu.dot_dimension_numbers<[1], [1], [0], [0], [0, 0, 1, 0], [], []>} : vector<8x8xf32>, vector<8x8xf32>, vector<8x8xf32> -> vector<8x8xf32>
    %cst_58 = arith.constant 0.353553385 : f32
    %138 = vector.broadcast %cst_58 : f32 to vector<8x8xf32>
    %139 = arith.mulf %137, %138 : vector<8x8xf32>
    %cst_59 = arith.constant dense<0xFF800000> : vector<8xf32>
    %140 = vector.multi_reduction <maximumf>, %139, %cst_59 [1] : vector<8x8xf32> to vector<8xf32>
    %141 = vector.shape_cast %140 : vector<8xf32> to vector<8x1xf32>
    %142 = vector.broadcast %141 : vector<8x1xf32> to vector<8x8xf32>
    %143 = arith.subf %139, %142 : vector<8x8xf32>
    %144 = math.exp %143 : vector<8x8xf32>
    %cst_60 = arith.constant dense<0.000000e+00> : vector<8xf32>
    %145 = vector.multi_reduction <add>, %144, %cst_60 [1] : vector<8x8xf32> to vector<8xf32>
    %146 = vector.shape_cast %145 : vector<8xf32> to vector<8x1xf32>
    %147 = tpu.reciprocal %146 {approx = true} : vector<8x1xf32> -> vector<8x1xf32>
    %148 = vector.broadcast %147 : vector<8x1xf32> to vector<8x8xf32>
    %149 = arith.mulf %144, %148 : vector<8x8xf32>
    %cst_61 = arith.constant dense<0.000000e+00> : vector<8x8xf32>
    %150 = tpu.matmul %149, %136, %cst_61 {dimension_numbers = #tpu.dot_dimension_numbers<[1], [0], [0], [1], [0, 0, 1, 1], [], []>} : vector<8x8xf32>, vector<8x8xf32>, vector<8x8xf32> -> vector<8x8xf32>
    %151 = vector.extract_strided_slice %126 {offsets = [0, 8], sizes = [8, 8], strides = [1, 1]} : vector<8x32xf32> to vector<8x8xf32>
    %152 = vector.extract_strided_slice %132 {offsets = [0, 8], sizes = [8, 8], strides = [1, 1]} : vector<8x32xf32> to vector<8x8xf32>
    %153 = vector.extract_strided_slice %133 {offsets = [0, 8], sizes = [8, 8], strides = [1, 1]} : vector<8x32xf32> to vector<8x8xf32>
    %cst_62 = arith.constant dense<0.000000e+00> : vector<8x8xf32>
    %154 = tpu.matmul %151, %152, %cst_62 {dimension_numbers = #tpu.dot_dimension_numbers<[1], [1], [0], [0], [0, 0, 1, 0], [], []>} : vector<8x8xf32>, vector<8x8xf32>, vector<8x8xf32> -> vector<8x8xf32>
    %cst_63 = arith.constant 0.353553385 : f32
    %155 = vector.broadcast %cst_63 : f32 to vector<8x8xf32>
    %156 = arith.mulf %154, %155 : vector<8x8xf32>
    %cst_64 = arith.constant dense<0xFF800000> : vector<8xf32>
    %157 = vector.multi_reduction <maximumf>, %156, %cst_64 [1] : vector<8x8xf32> to vector<8xf32>
    %158 = vector.shape_cast %157 : vector<8xf32> to vector<8x1xf32>
    %159 = vector.broadcast %158 : vector<8x1xf32> to vector<8x8xf32>
    %160 = arith.subf %156, %159 : vector<8x8xf32>
    %161 = math.exp %160 : vector<8x8xf32>
    %cst_65 = arith.constant dense<0.000000e+00> : vector<8xf32>
    %162 = vector.multi_reduction <add>, %161, %cst_65 [1] : vector<8x8xf32> to vector<8xf32>
    %163 = vector.shape_cast %162 : vector<8xf32> to vector<8x1xf32>
    %164 = tpu.reciprocal %163 {approx = true} : vector<8x1xf32> -> vector<8x1xf32>
    %165 = vector.broadcast %164 : vector<8x1xf32> to vector<8x8xf32>
    %166 = arith.mulf %161, %165 : vector<8x8xf32>
    %cst_66 = arith.constant dense<0.000000e+00> : vector<8x8xf32>
    %167 = tpu.matmul %166, %153, %cst_66 {dimension_numbers = #tpu.dot_dimension_numbers<[1], [0], [0], [1], [0, 0, 1, 1], [], []>} : vector<8x8xf32>, vector<8x8xf32>, vector<8x8xf32> -> vector<8x8xf32>
    %168 = vector.extract_strided_slice %126 {offsets = [0, 16], sizes = [8, 8], strides = [1, 1]} : vector<8x32xf32> to vector<8x8xf32>
    %169 = vector.extract_strided_slice %132 {offsets = [0, 16], sizes = [8, 8], strides = [1, 1]} : vector<8x32xf32> to vector<8x8xf32>
    %170 = vector.extract_strided_slice %133 {offsets = [0, 16], sizes = [8, 8], strides = [1, 1]} : vector<8x32xf32> to vector<8x8xf32>
    %cst_67 = arith.constant dense<0.000000e+00> : vector<8x8xf32>
    %171 = tpu.matmul %168, %169, %cst_67 {dimension_numbers = #tpu.dot_dimension_numbers<[1], [1], [0], [0], [0, 0, 1, 0], [], []>} : vector<8x8xf32>, vector<8x8xf32>, vector<8x8xf32> -> vector<8x8xf32>
    %cst_68 = arith.constant 0.353553385 : f32
    %172 = vector.broadcast %cst_68 : f32 to vector<8x8xf32>
    %173 = arith.mulf %171, %172 : vector<8x8xf32>
    %cst_69 = arith.constant dense<0xFF800000> : vector<8xf32>
    %174 = vector.multi_reduction <maximumf>, %173, %cst_69 [1] : vector<8x8xf32> to vector<8xf32>
    %175 = vector.shape_cast %174 : vector<8xf32> to vector<8x1xf32>
    %176 = vector.broadcast %175 : vector<8x1xf32> to vector<8x8xf32>
    %177 = arith.subf %173, %176 : vector<8x8xf32>
    %178 = math.exp %177 : vector<8x8xf32>
    %cst_70 = arith.constant dense<0.000000e+00> : vector<8xf32>
    %179 = vector.multi_reduction <add>, %178, %cst_70 [1] : vector<8x8xf32> to vector<8xf32>
    %180 = vector.shape_cast %179 : vector<8xf32> to vector<8x1xf32>
    %181 = tpu.reciprocal %180 {approx = true} : vector<8x1xf32> -> vector<8x1xf32>
    %182 = vector.broadcast %181 : vector<8x1xf32> to vector<8x8xf32>
    %183 = arith.mulf %178, %182 : vector<8x8xf32>
    %cst_71 = arith.constant dense<0.000000e+00> : vector<8x8xf32>
    %184 = tpu.matmul %183, %170, %cst_71 {dimension_numbers = #tpu.dot_dimension_numbers<[1], [0], [0], [1], [0, 0, 1, 1], [], []>} : vector<8x8xf32>, vector<8x8xf32>, vector<8x8xf32> -> vector<8x8xf32>
    %185 = vector.extract_strided_slice %126 {offsets = [0, 24], sizes = [8, 8], strides = [1, 1]} : vector<8x32xf32> to vector<8x8xf32>
    %186 = vector.extract_strided_slice %132 {offsets = [0, 24], sizes = [8, 8], strides = [1, 1]} : vector<8x32xf32> to vector<8x8xf32>
    %187 = vector.extract_strided_slice %133 {offsets = [0, 24], sizes = [8, 8], strides = [1, 1]} : vector<8x32xf32> to vector<8x8xf32>
    %cst_72 = arith.constant dense<0.000000e+00> : vector<8x8xf32>
    %188 = tpu.matmul %185, %186, %cst_72 {dimension_numbers = #tpu.dot_dimension_numbers<[1], [1], [0], [0], [0, 0, 1, 0], [], []>} : vector<8x8xf32>, vector<8x8xf32>, vector<8x8xf32> -> vector<8x8xf32>
    %cst_73 = arith.constant 0.353553385 : f32
    %189 = vector.broadcast %cst_73 : f32 to vector<8x8xf32>
    %190 = arith.mulf %188, %189 : vector<8x8xf32>
    %cst_74 = arith.constant dense<0xFF800000> : vector<8xf32>
    %191 = vector.multi_reduction <maximumf>, %190, %cst_74 [1] : vector<8x8xf32> to vector<8xf32>
    %192 = vector.shape_cast %191 : vector<8xf32> to vector<8x1xf32>
    %193 = vector.broadcast %192 : vector<8x1xf32> to vector<8x8xf32>
    %194 = arith.subf %190, %193 : vector<8x8xf32>
    %195 = math.exp %194 : vector<8x8xf32>
    %cst_75 = arith.constant dense<0.000000e+00> : vector<8xf32>
    %196 = vector.multi_reduction <add>, %195, %cst_75 [1] : vector<8x8xf32> to vector<8xf32>
    %197 = vector.shape_cast %196 : vector<8xf32> to vector<8x1xf32>
    %198 = tpu.reciprocal %197 {approx = true} : vector<8x1xf32> -> vector<8x1xf32>
    %199 = vector.broadcast %198 : vector<8x1xf32> to vector<8x8xf32>
    %200 = arith.mulf %195, %199 : vector<8x8xf32>
    %cst_76 = arith.constant dense<0.000000e+00> : vector<8x8xf32>
    %201 = tpu.matmul %200, %187, %cst_76 {dimension_numbers = #tpu.dot_dimension_numbers<[1], [0], [0], [1], [0, 0, 1, 1], [], []>} : vector<8x8xf32>, vector<8x8xf32>, vector<8x8xf32> -> vector<8x8xf32>
    %202 = tpu.concatenate %150, %167, %184, %201 in 1 : vector<8x8xf32>, vector<8x8xf32>, vector<8x8xf32>, vector<8x8xf32> -> vector<8x32xf32>
    %c0_77 = arith.constant 0 : index
    %c0_78 = arith.constant 0 : index
    %203 = vector.load %arg13[%c0_77, %c0_78] : memref<32x32xf32, #tpu.memory_space<vmem>>, vector<32x32xf32>
    %cst_79 = arith.constant dense<0.000000e+00> : vector<8x32xf32>
    %204 = tpu.matmul %202, %203, %cst_79 {dimension_numbers = #tpu.dot_dimension_numbers<[1], [0], [0], [1], [0, 0, 1, 1], [], []>} : vector<8x32xf32>, vector<32x32xf32>, vector<8x32xf32> -> vector<8x32xf32>
    %c0_80 = arith.constant 0 : index
    %c0_81 = arith.constant 0 : index
    %205 = vector.load %arg14[%c0_80, %c0_81] : memref<1x32xf32, #tpu.memory_space<vmem>>, vector<1x32xf32>
    %206 = vector.broadcast %205 : vector<1x32xf32> to vector<8x32xf32>
    %207 = arith.addf %204, %206 : vector<8x32xf32>
    %208 = arith.addf %121, %207 : vector<8x32xf32>
    %c0_82 = arith.constant 0 : index
    %c0_83 = arith.constant 0 : index
    %209 = vector.load %arg15[%c0_82, %c0_83] : memref<1x32xf32, #tpu.memory_space<vmem>>, vector<1x32xf32>
    %c0_84 = arith.constant 0 : index
    %c0_85 = arith.constant 0 : index
    %210 = vector.load %arg16[%c0_84, %c0_85] : memref<1x32xf32, #tpu.memory_space<vmem>>, vector<1x32xf32>
    %cst_86 = arith.constant dense<0.000000e+00> : vector<8xf32>
    %211 = vector.multi_reduction <add>, %208, %cst_86 [1] : vector<8x32xf32> to vector<8xf32>
    %212 = vector.shape_cast %211 : vector<8xf32> to vector<8x1xf32>
    %cst_87 = arith.constant 3.200000e+01 : f32
    %213 = vector.broadcast %cst_87 : f32 to vector<8x1xf32>
    %214 = arith.divf %212, %213 : vector<8x1xf32>
    %215 = vector.broadcast %214 : vector<8x1xf32> to vector<8x32xf32>
    %216 = arith.subf %208, %215 : vector<8x32xf32>
    %217 = arith.mulf %216, %216 : vector<8x32xf32>
    %cst_88 = arith.constant dense<0.000000e+00> : vector<8xf32>
    %218 = vector.multi_reduction <add>, %217, %cst_88 [1] : vector<8x32xf32> to vector<8xf32>
    %219 = vector.shape_cast %218 : vector<8xf32> to vector<8x1xf32>
    %cst_89 = arith.constant 3.200000e+01 : f32
    %220 = vector.broadcast %cst_89 : f32 to vector<8x1xf32>
    %221 = arith.divf %219, %220 : vector<8x1xf32>
    %222 = vector.broadcast %214 : vector<8x1xf32> to vector<8x32xf32>
    %223 = arith.subf %208, %222 : vector<8x32xf32>
    %cst_90 = arith.constant 9.99999974E-6 : f32
    %224 = vector.broadcast %cst_90 : f32 to vector<8x1xf32>
    %225 = arith.addf %221, %224 : vector<8x1xf32>
    %226 = math.rsqrt %225 : vector<8x1xf32>
    %227 = vector.broadcast %226 : vector<8x1xf32> to vector<8x32xf32>
    %228 = arith.mulf %223, %227 : vector<8x32xf32>
    %229 = vector.broadcast %209 : vector<1x32xf32> to vector<8x32xf32>
    %230 = arith.mulf %228, %229 : vector<8x32xf32>
    %231 = vector.broadcast %210 : vector<1x32xf32> to vector<8x32xf32>
    %232 = arith.addf %230, %231 : vector<8x32xf32>
    %c0_91 = arith.constant 0 : index
    %c0_92 = arith.constant 0 : index
    %233 = vector.load %arg17[%c0_91, %c0_92] : memref<32x128xf32, #tpu.memory_space<vmem>>, vector<32x128xf32>
    %cst_93 = arith.constant dense<0.000000e+00> : vector<8x128xf32>
    %234 = tpu.matmul %232, %233, %cst_93 {dimension_numbers = #tpu.dot_dimension_numbers<[1], [0], [0], [1], [0, 0, 1, 1], [], []>} : vector<8x32xf32>, vector<32x128xf32>, vector<8x128xf32> -> vector<8x128xf32>
    %c0_94 = arith.constant 0 : index
    %c0_95 = arith.constant 0 : index
    %235 = vector.load %arg18[%c0_94, %c0_95] : memref<1x128xf32, #tpu.memory_space<vmem>>, vector<1x128xf32>
    %236 = vector.broadcast %235 : vector<1x128xf32> to vector<8x128xf32>
    %237 = arith.addf %234, %236 : vector<8x128xf32>
    %cst_96 = arith.constant 0.000000e+00 : f32
    %238 = vector.broadcast %cst_96 : f32 to vector<8x128xf32>
    %239 = arith.maximumf %237, %238 : vector<8x128xf32>
    %c0_97 = arith.constant 0 : index
    %c0_98 = arith.constant 0 : index
    %240 = vector.load %arg19[%c0_97, %c0_98] : memref<128x32xf32, #tpu.memory_space<vmem>>, vector<128x32xf32>
    %cst_99 = arith.constant dense<0.000000e+00> : vector<8x32xf32>
    %241 = tpu.matmul %239, %240, %cst_99 {dimension_numbers = #tpu.dot_dimension_numbers<[1], [0], [0], [1], [0, 0, 1, 1], [], []>} : vector<8x128xf32>, vector<128x32xf32>, vector<8x32xf32> -> vector<8x32xf32>
    %c0_100 = arith.constant 0 : index
    %c0_101 = arith.constant 0 : index
    %242 = vector.load %arg20[%c0_100, %c0_101] : memref<1x32xf32, #tpu.memory_space<vmem>>, vector<1x32xf32>
    %243 = vector.broadcast %242 : vector<1x32xf32> to vector<8x32xf32>
    %244 = arith.addf %241, %243 : vector<8x32xf32>
    %245 = arith.addf %232, %244 : vector<8x32xf32>
    %c0_102 = arith.constant 0 : index
    %c0_103 = arith.constant 0 : index
    %246 = vector.load %arg21[%c0_102, %c0_103] : memref<1x32xf32, #tpu.memory_space<vmem>>, vector<1x32xf32>
    %c0_104 = arith.constant 0 : index
    %c0_105 = arith.constant 0 : index
    %247 = vector.load %arg22[%c0_104, %c0_105] : memref<1x32xf32, #tpu.memory_space<vmem>>, vector<1x32xf32>
    %cst_106 = arith.constant dense<0.000000e+00> : vector<8xf32>
    %248 = vector.multi_reduction <add>, %245, %cst_106 [1] : vector<8x32xf32> to vector<8xf32>
    %249 = vector.shape_cast %248 : vector<8xf32> to vector<8x1xf32>
    %cst_107 = arith.constant 3.200000e+01 : f32
    %250 = vector.broadcast %cst_107 : f32 to vector<8x1xf32>
    %251 = arith.divf %249, %250 : vector<8x1xf32>
    %252 = vector.broadcast %251 : vector<8x1xf32> to vector<8x32xf32>
    %253 = arith.subf %245, %252 : vector<8x32xf32>
    %254 = arith.mulf %253, %253 : vector<8x32xf32>
    %cst_108 = arith.constant dense<0.000000e+00> : vector<8xf32>
    %255 = vector.multi_reduction <add>, %254, %cst_108 [1] : vector<8x32xf32> to vector<8xf32>
    %256 = vector.shape_cast %255 : vector<8xf32> to vector<8x1xf32>
    %cst_109 = arith.constant 3.200000e+01 : f32
    %257 = vector.broadcast %cst_109 : f32 to vector<8x1xf32>
    %258 = arith.divf %256, %257 : vector<8x1xf32>
    %259 = vector.broadcast %251 : vector<8x1xf32> to vector<8x32xf32>
    %260 = arith.subf %245, %259 : vector<8x32xf32>
    %cst_110 = arith.constant 9.99999974E-6 : f32
    %261 = vector.broadcast %cst_110 : f32 to vector<8x1xf32>
    %262 = arith.addf %258, %261 : vector<8x1xf32>
    %263 = math.rsqrt %262 : vector<8x1xf32>
    %264 = vector.broadcast %263 : vector<8x1xf32> to vector<8x32xf32>
    %265 = arith.mulf %260, %264 : vector<8x32xf32>
    %266 = vector.broadcast %246 : vector<1x32xf32> to vector<8x32xf32>
    %267 = arith.mulf %265, %266 : vector<8x32xf32>
    %268 = vector.broadcast %247 : vector<1x32xf32> to vector<8x32xf32>
    %269 = arith.addf %267, %268 : vector<8x32xf32>
    %c0_111 = arith.constant 0 : index
    %c0_112 = arith.constant 0 : index
    %c0_113 = arith.constant 0 : index
    %270 = vector.load %arg23[%c0_111, %c0_112, %c0_113] : memref<1x8x32xf32, #tpu.memory_space<vmem>>, vector<1x8x32xf32>
    %271 = vector.shape_cast %270 : vector<1x8x32xf32> to vector<8x32xf32>
    %272 = vector.shape_cast %269 : vector<8x32xf32> to vector<1x8x32xf32>
    tpu.vector_store %arg23[%c0_111, %c0_112, %c0_113], %272 {strides = array<i32>} : memref<1x8x32xf32, #tpu.memory_space<vmem>>, vector<1x8x32xf32>,
    return
  }
  func.func @transform_0(%arg0: i32) -> (i32, i32, i32) {
    %c0_i32 = arith.constant 0 : i32
    %c0_i32_0 = arith.constant 0 : i32
    %c0_i32_1 = arith.constant 0 : i32
    return %arg0, %c0_i32, %c0_i32_0 : i32, i32, i32
  }
  func.func @transform_1(%arg0: i32) -> (i32, i32, i32) {
    %c0_i32 = arith.constant 0 : i32
    %c0_i32_0 = arith.constant 0 : i32
    %c0_i32_1 = arith.constant 0 : i32
    return %arg0, %c0_i32, %c0_i32_0 : i32, i32, i32
  }
  func.func @transform_2(%arg0: i32) -> (i32, i32) {
    %c0_i32 = arith.constant 0 : i32
    %c0_i32_0 = arith.constant 0 : i32
    %c0_i32_1 = arith.constant 0 : i32
    return %c0_i32, %c0_i32_0 : i32, i32
  }
  func.func @transform_3(%arg0: i32) -> (i32, i32) {
    %c0_i32 = arith.constant 0 : i32
    %c0_i32_0 = arith.constant 0 : i32
    %c0_i32_1 = arith.constant 0 : i32
    return %c0_i32, %c0_i32_0 : i32, i32
  }
  func.func @transform_4(%arg0: i32) -> (i32, i32) {
    %c0_i32 = arith.constant 0 : i32
    %c0_i32_0 = arith.constant 0 : i32
    %c0_i32_1 = arith.constant 0 : i32
    return %c0_i32, %c0_i32_0 : i32, i32
  }
  func.func @transform_5(%arg0: i32) -> (i32, i32) {
    %c0_i32 = arith.constant 0 : i32
    %c0_i32_0 = arith.constant 0 : i32
    %c0_i32_1 = arith.constant 0 : i32
    return %c0_i32, %c0_i32_0 : i32, i32
  }
  func.func @transform_6(%arg0: i32) -> (i32, i32) {
    %c0_i32 = arith.constant 0 : i32
    %c0_i32_0 = arith.constant 0 : i32
    %c0_i32_1 = arith.constant 0 : i32
    return %c0_i32, %c0_i32_0 : i32, i32
  }
  func.func @transform_7(%arg0: i32) -> (i32, i32) {
    %c0_i32 = arith.constant 0 : i32
    %c0_i32_0 = arith.constant 0 : i32
    %c0_i32_1 = arith.constant 0 : i32
    return %c0_i32, %c0_i32_0 : i32, i32
  }
  func.func @transform_8(%arg0: i32) -> (i32, i32) {
    %c0_i32 = arith.constant 0 : i32
    %c0_i32_0 = arith.constant 0 : i32
    %c0_i32_1 = arith.constant 0 : i32
    return %c0_i32, %c0_i32_0 : i32, i32
  }
  func.func @transform_9(%arg0: i32) -> (i32, i32) {
    %c0_i32 = arith.constant 0 : i32
    %c0_i32_0 = arith.constant 0 : i32
    %c0_i32_1 = arith.constant 0 : i32
    return %c0_i32, %c0_i32_0 : i32, i32
  }
  func.func @transform_10(%arg0: i32) -> (i32, i32) {
    %c0_i32 = arith.constant 0 : i32
    %c0_i32_0 = arith.constant 0 : i32
    %c0_i32_1 = arith.constant 0 : i32
    return %c0_i32, %c0_i32_0 : i32, i32
  }
  func.func @transform_11(%arg0: i32) -> (i32, i32) {
    %c0_i32 = arith.constant 0 : i32
    %c0_i32_0 = arith.constant 0 : i32
    %c0_i32_1 = arith.constant 0 : i32
    return %c0_i32, %c0_i32_0 : i32, i32
  }
  func.func @transform_12(%arg0: i32) -> (i32, i32) {
    %c0_i32 = arith.constant 0 : i32
    %c0_i32_0 = arith.constant 0 : i32
    %c0_i32_1 = arith.constant 0 : i32
    return %c0_i32, %c0_i32_0 : i32, i32
  }
  func.func @transform_13(%arg0: i32) -> (i32, i32) {
    %c0_i32 = arith.constant 0 : i32
    %c0_i32_0 = arith.constant 0 : i32
    %c0_i32_1 = arith.constant 0 : i32
    return %c0_i32, %c0_i32_0 : i32, i32
  }
  func.func @transform_14(%arg0: i32) -> (i32, i32) {
    %c0_i32 = arith.constant 0 : i32
    %c0_i32_0 = arith.constant 0 : i32
    %c0_i32_1 = arith.constant 0 : i32
    return %c0_i32, %c0_i32_0 : i32, i32
  }
  func.func @transform_15(%arg0: i32) -> (i32, i32) {
    %c0_i32 = arith.constant 0 : i32
    %c0_i32_0 = arith.constant 0 : i32
    %c0_i32_1 = arith.constant 0 : i32
    return %c0_i32, %c0_i32_0 : i32, i32
  }
  func.func @transform_16(%arg0: i32) -> (i32, i32) {
    %c0_i32 = arith.constant 0 : i32
    %c0_i32_0 = arith.constant 0 : i32
    %c0_i32_1 = arith.constant 0 : i32
    return %c0_i32, %c0_i32_0 : i32, i32
  }
  func.func @transform_17(%arg0: i32) -> (i32, i32) {
    %c0_i32 = arith.constant 0 : i32
    %c0_i32_0 = arith.constant 0 : i32
    %c0_i32_1 = arith.constant 0 : i32
    return %c0_i32, %c0_i32_0 : i32, i32
  }
  func.func @transform_18(%arg0: i32) -> (i32, i32) {
    %c0_i32 = arith.constant 0 : i32
    %c0_i32_0 = arith.constant 0 : i32
    %c0_i32_1 = arith.constant 0 : i32
    return %c0_i32, %c0_i32_0 : i32, i32
  }
  func.func @transform_19(%arg0: i32) -> (i32, i32) {
    %c0_i32 = arith.constant 0 : i32
    %c0_i32_0 = arith.constant 0 : i32
    %c0_i32_1 = arith.constant 0 : i32
    return %c0_i32, %c0_i32_0 : i32, i32
  }
  func.func @transform_20(%arg0: i32) -> (i32, i32) {
    %c0_i32 = arith.constant 0 : i32
    %c0_i32_0 = arith.constant 0 : i32
    %c0_i32_1 = arith.constant 0 : i32
    return %c0_i32, %c0_i32_0 : i32, i32
  }
  func.func @transform_21(%arg0: i32) -> (i32, i32) {
    %c0_i32 = arith.constant 0 : i32
    %c0_i32_0 = arith.constant 0 : i32
    %c0_i32_1 = arith.constant 0 : i32
    return %c0_i32, %c0_i32_0 : i32, i32
  }
  func.func @transform_22(%arg0: i32) -> (i32, i32, i32) {
    %c0_i32 = arith.constant 0 : i32
    %c0_i32_0 = arith.constant 0 : i32
    %c0_i32_1 = arith.constant 0 : i32
    return %arg0, %c0_i32, %c0_i32_0 : i32, i32, i32
  }
}

</mosaic_0001>

<bundles_post_ra>
// kernel: tpu_custom_call.1
= control target key start
LH: loop header
LB: loop body
LE: loop exit
PB: predicated region body
PF: predicated region fallthrough
CT: control target
= control target key end

     0   :  { %s2701_s0 = inlined_call_operand.hbm [shape: f32[2,8,32], index: 0, kind: input, shape index: {}]   ;;  %s2702_s1 = inlined_call_operand.hbm [shape: f32[2,8,32], index: 1, kind: input, shape index: {}]   ;;  %s2703_s2 = inlined_call_operand.vmem [shape: f32[32,96], index: 2, kind: input, shape index: {}]   ;;  %s2704_s3 = inlined_call_operand.vmem [shape: f32[1,96], index: 3, kind: input, shape index: {}]   ;;  %s2705_s4 = inlined_call_operand.vmem [shape: f32[32,32], index: 4, kind: input, shape index: {}]   ;;  %s2706_s5 = inlined_call_operand.vmem [shape: f32[1,32], index: 5, kind: input, shape index: {}]   ;;  %s2707_s6 = inlined_call_operand.vmem [shape: f32[1,32], index: 6, kind: input, shape index: {}]   ;;  %s2708_s7 = inlined_call_operand.vmem [shape: f32[1,32], index: 7, kind: input, shape index: {}]   ;;  %s2709_s8 = inlined_call_operand.vmem [shape: f32[32,32], index: 8, kind: input, shape index: {}]   ;;  %s2710_s9 = inlined_call_operand.vmem [shape: f32[1,32], index: 9, kind: input, shape index: {}]   ;;  %s2711_s10 = inlined_call_operand.vmem [shape: f32[32,64], index: 10, kind: input, shape index: {}]   ;;  %s2712_s11 = inlined_call_operand.vmem [shape: f32[1,64], index: 11, kind: input, shape index: {}]   ;;  %s2713_s12 = inlined_call_operand.vmem [shape: f32[32,32], index: 12, kind: input, shape index: {}]   ;;  %s2714_s13 = inlined_call_operand.vmem [shape: f32[1,32], index: 13, kind: input, shape index: {}]   ;;  %s2715_s14 = inlined_call_operand.vmem [shape: f32[1,32], index: 14, kind: input, shape index: {}]   ;;  %s2716_s15 = inlined_call_operand.vmem [shape: f32[1,32], index: 15, kind: input, shape index: {}]   ;;  %s2717_s16 = inlined_call_operand.hbm [shape: f32[32,128], index: 16, kind: input, shape index: {}]   ;;  %s2718_s17 = inlined_call_operand.vmem [shape: f32[1,128], index: 17, kind: input, shape index: {}]   ;;  %s2719_s18 = inlined_call_operand.vmem [shape: f32[128,32], index: 18, kind: input, shape index: {}]   ;;  %s2720_s19 = inlined_call_operand.vmem [shape: f32[1,32], index: 19, kind: input, shape index: {}]   ;;  %s2721_s20 = inlined_call_operand.vmem [shape: f32[1,32], index: 20, kind: input, shape index: {}]   ;;  %s2722_s21 = inlined_call_operand.vmem [shape: f32[1,32], index: 21, kind: input, shape index: {}]   ;;  %s2723_s22 = inlined_call_operand.hbm [shape: f32[2,8,32], index: 22, kind: output, shape index: {}]  }
   0x1   :  { %2742 = sst [smem:[#allocation20_spill]] %s2701_s0 }
   0x2   :  { %2743 = sst [smem:[#allocation21_spill]] %s2702_s1 }
   0x3   :  { %2744 = sst [smem:[#allocation22_spill]] %s2703_s2 }
   0x4   :  { %2745 = sst [smem:[#allocation23_spill]] %s2704_s3 }
   0x5   :  { %2746 = sst [smem:[#allocation24_spill]] %s2705_s4 }
   0x6   :  { %2747 = sst [smem:[#allocation25_spill]] %s2706_s5 }
   0x7   :  { %2748 = sst [smem:[#allocation26_spill]] %s2707_s6 }
   0x8   :  { %2749 = sst [smem:[#allocation27_spill]] %s2715_s14 }
   0x9   :  { %2750 = sst [smem:[#allocation28_spill]] %s2716_s15 }
   0xa   :  { %2751 = sst [smem:[#allocation29_spill]] %s2717_s16 }
   0xb   :  { %2752 = sst [smem:[#allocation30_spill]] %s2718_s17 }
   0xc   :  { %2753 = sst [smem:[#allocation31_spill]] %s2719_s18 }
   0xd   :  { %2754 = sst [smem:[#allocation32_spill]] %s2720_s19 }
   0xe   :  { %2755 = sst [smem:[#allocation33_spill]] %s2721_s20 }
   0xf   :  { %2756 = sst [smem:[#allocation34_spill]] %s2722_s21 }
  0x10   :  { %2757 = sst [smem:[#allocation35_spill]] %s2723_s22 }
  0x11   :  { %27 = vsyncpa [#allocation3], 0 }
  0x12   :  { %29 = vsyncpa [#allocation3 + $0x1], 0 }
  0x13   :  { %30 = vsyncpa [#allocation6], 0 }
  0x14   :  { %32 = vsyncpa [#allocation6 + $0x1], 0 }
  0x15   :  { %33 = vsyncpa [#allocation4], 0 }
  0x16   :  { %35 = vsyncpa [#allocation4 + $0x1], 0  ;;  %s2256_s3 = smov 0   ;;  %s2258_s28 = smov 0  }
  0x17   :  { %s2260_s29 = smov 0   ;;  %s2262_s30 = smov 0  }
  0x18 LB: > { %2758 = sst [smem:[#allocation13_spill]] %s2109_s3  ;;  %s2280_s1 = sadd.s32 4294967295, %s2121_s30   ;;  %s2121_s30 = sphi %s2262_s30, %s2797_s30   ;;  %s2117_s29 = sphi %s2260_s29, %s2799_s29   ;;  %s2113_s28 = sphi %s2258_s28, %s2801_s28   ;;  %s2109_s3 = sphi %s2256_s3, %s2800_s3  }
  0x19   : > { %2759 = sst [smem:[#allocation14_spill]] %s2117_s29  ;;  %p1779_p0 = scmp.ge.s32.totalorder %s2121_s30, 1 }
  0x1a   : > { %2760 = sst [smem:[#allocation15_spill]] %s2121_s30  ;;  %p62_p1 = scmp.eq.s32.totalorder %s2280_s1, 0 }
  0x1b   : > { %s2761_s16 = sld [smem:[#allocation29_spill]]  ;;  %p544_p2 = scmp.lt.s32.totalorder %s2121_s30, 3 }
  0x1c   : > { %s2123_s24 = smov [#allocation7]   ;;  %s2124_s25 = smov 128  }
  0x1d   : > { %p2285_p3 = pnand %p1779_p0, %p544_p2  ;;  %s599_s6 = sshll.u32 %s2123_s24, 4  ;;  %s600_s6 = int_to_ptr.vmem [resolvable:$true] %s599_s6 }
  0x1e   : > { %s2125_s26 = smov 8   ;;  %s1778_s2 = sadd.s32 4294967294, %s2121_s30  }
  0x1f   : > { %p1835_p4 = pneg %p2285_p3  ;;  %s2296_s27 = sadd.s32 1, %s2121_s30  }
  0x20   : > { %2763 = sst [smem:[#allocation16_spill]] %s2296_s27  ;;  %s48_s4 = sadd.s32 1, %s2117_s29 }
  0x21   : > { %s597_s23 = sshll.u32 %s2761_s16, 4  ;;  %p1836_p6 = pnand %p1835_p4, %p62_p1  ;;  %s598_s23 = int_to_ptr.hbm [resolvable:$true] %s597_s23 }
  0x22   : > { %s45_s0 = ssub.s32 %s2121_s30, %s2296_s27  ;;  %p55_p7 = scmp.ne.s32.totalorder %s2117_s29, %s2113_s28 }
  0x23   : > { %1838 = dma.hbm_to_vmem [thread:$0]  (!%p1836_p6), %s598_s23, 512, %s600_s6, [#allocation6], %s2124_s25, %s2124_s25, %s2125_s26  }
  0x24   : > { %p46_p8 = scmp.eq.s32.totalorder %s45_s0, 0  ;;  %p56_p9 = scmp.eq.s32.totalorder %s2121_s30, 0 }
  0x25   : > { %p61_p10 = scmp.ne.s32.totalorder %s2113_s28, %s2109_s3  ;;  %p531_p11 = scmp.eq.s32.totalorder %s2280_s1, 1 }
  0x26   : > { %s2308_s24 = scalar_select %p46_p8, %s2117_s29, %s48_s4  }
  0x27   : > { %p2310_p12 = por %p56_p9, %p55_p7  ;;  %p2316_p13 = por %p62_p1, %p61_p10 }
  0x28   : > { %2764 = sst [smem:[#allocation17_spill]] %s2308_s24  ;;  %p2320_p0 = por %p531_p11, %p55_p7 }
  0x29   : > { %p537_p2 = scmp.eq.s32.totalorder %s1778_s2, 1  ;;  %p1851_p4 = scmp.lt.s32.totalorder %s2121_s30, 2 }
  0x2a   : > { %s2767_s6 = scalar_select %p2320_p0, 1, 0 }
  0x2b   : > { %s628_s25 = sand.u32 1, %s2117_s29   ;;  %p2326_p6 = por %p537_p2, %p61_p10 }
  0x2c   : > { %2768 = sst [smem:[#allocation18_spill]] %s2767_s6  ;;  %s1782_s4 = sshll.u32 %s628_s25, 3 }
  0x2d   : > { %s2769_s26 = scalar_select %p2326_p6, 1, 0 }
  0x2e   : > { %s1783_s0 = sshll.u32 %s2121_s30, 3  ;;  %s2771_s3 = sld [smem:[#allocation20_spill]] }
  0x2f   : > { %2770 = sst [smem:[#allocation19_spill]] %s2769_s26  ;;  %s632_s19 = scalar_lea.vmem [#allocation2], %s1782_s4 }
  0x30   : > { %s640_s17 = sshll.u32 %s632_s19, 4  ;;  %p2336_p7 = pnand %p1851_p4, %p2310_p12  ;;  %s641_s17 = int_to_ptr.vmem [resolvable:$true] %s640_s17 }
  0x31   : > { %s2774_s15 = sld [smem:[#allocation21_spill]]  ;;  %s647_s14 = sand.u32 1, %s2121_s30  }
  0x32   : > { %s629_s18 = scalar_lea.sflag [#allocation3], %s628_s25  ;;  %p1991_p9 = pneg %p2336_p7 }
  0x34   : > { %s2772_s21 = smov %s2771_s3  ;;  %s636_s22 = scalar_lea.hbm %s2771_s3, %s1783_s0 }
  0x35   : > { %s638_s20 = sshll.u32 %s636_s22, 4  ;;  %s1994_s3 = scalar_lea.hbm %s2772_s21, 16  ;;  %s639_s20 = int_to_ptr.hbm [resolvable:$true] %s638_s20 }
  0x36   : > { %s1987_s27 = sshra.s32 %s639_s20, 4  ;;  %s1988_s27 = int_to_ptr.hbm [resolvable:$true] %s1987_s27 }
  0x37   : > { %s655_s26 = scalar_lea.hbm %s2774_s15, %s1783_s0  ;;  %s1989_s22 = scalar_lea.hbm %s1988_s27, 8 }
  0x38   : > { %p1990_p8 = scmp.ne.s32.totalorder %s1988_s27, %s1989_s22  ;;  %p1995_p12 = scmp.lt.s32.totalorder %s1988_s27, %s2772_s21 }
  0x39   : > { %p1996_p2 = scmp.lt.s32.totalorder %s1994_s3, %s1989_s22 }
  0x3a   : > { %p1992_p10 = pnand %p1991_p9, %p1990_p8 }
  0x3b   : > { %p1997_p4 = por %p1996_p2, %p1995_p12 }
  0x3c   : > { %p1993_p11 = pneg %p1992_p10 }
  0x3e   : > { %p1998_p5 = pnand %p1997_p4, %p1993_p11 }
  0x40   : > { %2001 = shalt.err (!%p1998_p5)
}
  0x41   : > { %1842 = dma.hbm_to_vmem [thread:$0]  (!%p2336_p7), %s639_s20, 128, %s641_s17, %s629_s18  }
  0x42   : > { %s657_s6 = sshll.u32 %s655_s26, 4  ;;  %s651_s25 = scalar_lea.vmem [#allocation5], %s1782_s4  ;;  %s658_s6 = int_to_ptr.hbm [resolvable:$true] %s657_s6 }
  0x43   : > { %s659_s0 = sshll.u32 %s651_s25, 4  ;;  %s648_s30 = scalar_lea.sflag [#allocation6], %s647_s14  ;;  %s660_s0 = int_to_ptr.vmem [resolvable:$true] %s659_s0 }
  0x44   : > { %s2017_s16 = sshra.s32 %s658_s6, 4  ;;  %s2024_s3 = scalar_lea.hbm %s2774_s15, 16  ;;  %s2018_s16 = int_to_ptr.hbm [resolvable:$true] %s2017_s16 }
  0x45   : > { %s2019_s19 = scalar_lea.hbm %s2018_s16, 8  ;;  %p2025_p5 = scmp.lt.s32.totalorder %s2018_s16, %s2774_s15 }
  0x46   : > { %p2020_p8 = scmp.ne.s32.totalorder %s2018_s16, %s2019_s19  ;;  %p2026_p11 = scmp.lt.s32.totalorder %s2024_s3, %s2019_s19 }
  0x48   : > { %p2022_p10 = pnand %p2020_p8, %p1991_p9  ;;  %p2027_p2 = por %p2026_p11, %p2025_p5 }
  0x4a   : > { %p2023_p12 = pneg %p2022_p10 }
  0x4c   : > { %p2028_p4 = pnand %p2027_p2, %p2023_p12 }
  0x4e   : > { %2031 = shalt.err (!%p2028_p4)
}
  0x4f   : > { %1845 = dma.hbm_to_vmem [thread:$0]  (!%p2336_p7), %s658_s6, 128, %s660_s0, %s648_s30  }
  0x50   : > { %668 = sbr.rel (%p2285_p3) target bundleno = 3269 (0xcc5), region = 108  ;;  %s2371_s14 = sand.u32 (!%p2285_p3), 1, %s2113_s28  }
  0x51   : > { %s2374_s18 = sshll.u32 (!%p2285_p3), %s2371_s14, 3  ;;  %s671_s20 = scalar_lea.sflag (!%p2285_p3), [#allocation3], %s2371_s14 }
  0x52   : > { %s674_s26 = scalar_lea.vmem (!%p2285_p3), [#allocation2], %s2374_s18 }
  0x55   : > { %2092 = dma.done.wait (%p2316_p13), %s671_s20, 128  }
  0x56   : > { %2094 = vsyncadd (%p2316_p13), %s671_s20, 4294967168  ;;  %s680_s30 = sand.u32 1, %s2280_s1   ;;  %s684_s4 = scalar_lea.vmem [#allocation5], %s2374_s18 }
  0x57   : > { %s681_s5 = scalar_lea.sflag [#allocation6], %s680_s30 }
  0x58   : > { %2096 = dma.done.wait (%p2316_p13), %s681_s5, 128  }
  0x59   : > { %2098 = vsyncadd (%p2316_p13), %s681_s5, 4294967168 }
  0x5a   : > { %2100 = dma.done.wait (%p62_p1), [#allocation6], 512  }
  0x5b   : > { %2102 = vsyncadd (%p62_p1), [#allocation6], 4294966784  ;;  %s2775_s6 = sld [smem:[#allocation22_spill]]  ;;  %vm771_vm0 = vcmask 261120   ;;  %v2404_v4 = vld [vmem:[%s674_s26] sm:$0xff]  ;;  %s2126_s17 = smov 72   ;;  %v758_v15 = vlaneseq }
  0x5c   : > { %s2776_s29 = sld [smem:[#allocation23_spill]]  ;;  %s2127_s20 = smov 120   ;;  %vm798_vm1 = vcmask 64512   ;;  %vm1076_vm3 = vcmask 130048   ;;  %vm1078_vm4 = vcmask 195584  }
  0x5d   : > { %s2128_s26 = smov 96   ;;  %s2129_s30 = smov 112   ;;  %v759_v16 = vshrl.u32 %v758_v15, 7  ;;  %v761_v17 = vand.u32 127, %v758_v15 }
  0x5e   : > { %s2130_s5 = smov 80   ;;  %s2738_s2 = smov 88  }
  0x5f   : > { %s2132_s24 = smov 104   ;;  %vm762_vm2 = vcmp.ge.s32.totalorder %v759_v16, %v761_v17  ;;  %s2133_s25 = smov 64  }
  0x60   : > { %s2134_s0 = smov 40   ;;  %s2135_s16 = smov 56  }
  0x61   : > { %v766_v0 = vld [vmem:[%s2775_s6 + $0x18] sm:$0xff]  ;;  %v765_v1 = vld [vmem:[%s2775_s6 + $0x10] sm:$0xff]  ;;  %v764_v2 = vld [vmem:[%s2775_s6 + $0x8] sm:$0xff]  ;;  %s2136_s19 = smov 48   ;;  %s2740_s23 = smov 16  }
  0x62   : > { %787 = vmatpush.msra.mxu0 %v766_v0  ;;  %v763_v3 = vld [vmem:[%s2775_s6] sm:$0xff]  ;;  %s2739_s27 = smov 8   ;;  %s2741_s22 = smov 24  }
  0x63   : > { %v1904_v5 = vld [vmem:[%s2776_s29] ss:$0 sm:$0xff]  ;;  %s2778_s29 = sld [smem:[#allocation25_spill]] }
  0x64   : > { %788 = vmatpush.msra.mxu0 %v765_v1 }
  0x66   : > { %789 = vmatpush.msra.mxu0 %v764_v2 }
  0x68   : > { %790 = vmatpush.msra.mxu0 %v763_v3 }
  0x69   : > { %1791 = vmatmul.msk.f32.vlgmr.msra.gmra.mxu0 %vm771_vm0, %v2404_v4 }
  0xe6   : > { %v792_v6 = vpop.f32.mrf.mxu0 }
  0xe7   : > { %v2411_v7 = vadd.f32 %v1904_v5, %v792_v6 }
  0xe9   : > { %998 = vrot.lane.b32.xlu2 %v2411_v7, %s2126_s17  ;;  %862 = vrot.lane.b32.xlu1 %v2411_v7, %s2127_s20 }
  0xea   : > { %796 = vrot.lane.b32.xlu0 %v2411_v7, %s2128_s26 }
  0xf1   : > { %929 = vrot.lane.b32.xlu2 %v2411_v7, %s2129_s30  ;;  %931 = vrot.lane.b32.xlu1 %v2411_v7, %s2130_s5 }
  0xf2   : > { %864 = vrot.lane.b32.xlu0 %v2411_v7, %s2738_s2 }
  0xfa   : > { %996 = vrot.lane.b32.xlu0 %v2411_v7, %s2132_s24 }
 0x143   : > { %v999_v10 = vpop.permute.xlu2 %998 }
 0x14b   : > { %v930_v13 = vpop.permute.xlu2 %929 }
 0x15b   : > { %v863_v8 = vpop.permute.xlu1 %862 }
 0x15c   : > { %v797_v9 = vpop.permute.xlu0 %796 }
 0x15d   : > { %1792 = vmatpush.xpose.msk.msra.mxu1 %vm798_vm1, %v797_v9 }
 0x160   : > { %1793 = vmatmul.msk.f32.vlgmr.msra.gmra.mxu1 %vm798_vm1, %v2411_v7 }
 0x163   : > { %v932_v11 = vpop.permute.xlu1 %931 }
 0x164   : > { %v865_v12 = vpop.permute.xlu0 %864  ;;  %1798 = vmatpush.xpose.msk.msrb.mxu1 %vm798_vm1, %v932_v11 }
 0x165   : > { %1795 = vmatpush.xpose.msk.msrb.mxu0 %vm798_vm1, %v865_v12 }
 0x168   : > { %1796 = vmatmul.msk.f32.vlgmr.msrb.gmra.mxu0 %vm798_vm1, %v863_v8  ;;  %1799 = vmatmul.msk.f32.vlgmr.msrb.gmra.mxu1 %vm798_vm1, %v930_v13 }
 0x169   : > { %1801 = vmatpush.xpose.msk.msra.mxu0 %vm798_vm1, %v999_v10 }
 0x16c   : > { %v997_v14 = vpop.permute.xlu0 %996 }
 0x170   : > { %1802 = vmatmul.msk.f32.vlgmr.msra.gmra.mxu0 %vm798_vm1, %v997_v14 }
 0x1dd   : > { %v820_v18 = vpop.f32.mrf.mxu1 }
 0x1de   : > { %v823_v19 = vmul.f32 0.35355338, %v820_v18 }
 0x1e0   : > { %v824_v20 = vsel %vm762_vm2, %v823_v19, -inf }
 0x1e1   : > { %v825_v21 = vsel %vm798_vm1, %v824_v20, -inf }
 0x1e2   : > { %826 = vmax.xlane.f32.xlu1 %v825_v21  ;;  %v1905_v21 = vld [vmem:[%s2778_s29] ss:$0 sm:$0xff] }
 0x1e5   : > { %v887_v22 = vpop.f32.mrf.mxu0  ;;  %v954_v23 = vpop.f32.mrf.mxu1 }
 0x1e6   : > { %v890_v24 = vmul.f32 0.35355338, %v887_v22  ;;  %v957_v25 = vmul.f32 0.35355338, %v954_v23 }
 0x1e8   : > { %v958_v26 = vsel %vm762_vm2, %v957_v25, -inf  ;;  %v891_v27 = vsel %vm762_vm2, %v890_v24, -inf }
 0x1e9   : > { %v959_v28 = vsel %vm798_vm1, %v958_v26, -inf  ;;  %v892_v29 = vsel %vm798_vm1, %v891_v27, -inf }
 0x1ea   : > { %960 = vmax.xlane.f32.xlu0 %v959_v28  ;;  %893 = vmax.xlane.f32.xlu2 %v892_v29  ;;  %v1184_v28 = vld [vmem:[%s2711_s10 + $0x10] sm:$0xff]  ;;  %v1183_v29 = vld [vmem:[%s2711_s10 + $0x8] sm:$0xff] }
 0x1ed   : > { %v1021_v30 = vpop.f32.mrf.mxu0 }
 0x1ee   : > { %v1024_v31 = vmul.f32 0.35355338, %v1021_v30 }
 0x1f0   : > { %v1025_v32 = vsel %vm762_vm2, %v1024_v31, -inf  ;;  %v757_v31 = vld [vmem:[%s684_s4] sm:$0xff]  ;;  %s2779_s4 = sld [smem:[#allocation26_spill]] }
 0x1f1   : > { %v1026_v33 = vsel %vm798_vm1, %v1025_v32, -inf }
 0x1f2   : > { %1027 = vmax.xlane.f32.xlu2 %v1026_v33 }
 0x1fe   : > { %836 = vrot.lane.b32.xlu0 %v2411_v7, %s2133_s25  ;;  %s2777_s25 = sld [smem:[#allocation24_spill]] }
 0x204   : > { %v1083_v11 = vld [vmem:[%s2777_s25 + $0x18] sm:$0xff]  ;;  %v1082_v12 = vld [vmem:[%s2777_s25 + $0x10] sm:$0xff]  ;;  %v1081_v13 = vld [vmem:[%s2777_s25 + $0x8] sm:$0xff] }
 0x205   : > { %1103 = vmatpush.msra.mxu1 %v1083_v11  ;;  %v1080_v14 = vld [vmem:[%s2777_s25] sm:$0xff] }
 0x206   : > { %1037 = vrot.lane.b32.xlu0 %v2411_v7, %s2134_s0  ;;  %s1822_s0 = sshll.u32 %s2280_s1, 3  ;;  %s755_s1 = scalar_lea.vmem [#allocation8], %s2374_s18 }
 0x207   : > { %1104 = vmatpush.msra.mxu1 %v1082_v12 }
 0x209   : > { %1105 = vmatpush.msra.mxu1 %v1081_v13 }
 0x20b   : > { %1106 = vmatpush.msra.mxu1 %v1080_v14 }
 0x255   : > { %v827_v34 = vpop.xlane.xlu1 %826 }
 0x256   : > { %v828_v35 = vsub.f32 %v824_v20, %v827_v34 }
 0x258   : > { %v829_v36 = vmul.f32 1.442695, %v828_v35 }
 0x25a   : > { %1917 = vpow2.f32 %v829_v36 }
 0x25d   : > { %v894_v37 = vpop.xlane.xlu2 %893  ;;  %v961_v38 = vpop.xlane.xlu0 %960 }
 0x25e   : > { %v895_v39 = vsub.f32 %v891_v27, %v894_v37  ;;  %v962_v40 = vsub.f32 %v958_v26, %v961_v38  ;;  %v2140_v26 = vmov 32.0   ;;  %v1185_v27 = vld [vmem:[%s2711_s10 + $0x18] sm:$0xff] }
 0x25f   : > { %1205 = vmatpush.msrb.mxu0 %v1185_v27 }
 0x260   : > { %v1918_v41 = vpop.eup %1917  ;;  %v896_v42 = vmul.f32 1.442695, %v895_v39  ;;  %v963_v43 = vmul.f32 1.442695, %v962_v40 }
 0x261   : > { %v831_v44 = vsel %vm798_vm1, %v1918_v41, 0.0  ;;  %1206 = vmatpush.msrb.mxu0 %v1184_v28 }
 0x262   : > { %1919 = vpow2.f32 %v896_v42  ;;  %832 = vadd.xlane.f32.xlu1 %v831_v44  ;;  %v1154_v42 = vld [vmem:[%s2709_s8 + $0x18] sm:$0xff]  ;;  %v1152_v44 = vld [vmem:[%s2709_s8 + $0x8] sm:$0xff] }
 0x263   : > { %1921 = vpow2.f32 %v963_v43  ;;  %1207 = vmatpush.msrb.mxu0 %v1183_v29  ;;  %v1153_v43 = vld [vmem:[%s2709_s8 + $0x10] sm:$0xff] }
 0x265   : > { %v1028_v45 = vpop.xlane.xlu2 %1027 }
 0x266   : > { %v1029_v46 = vsub.f32 %v1025_v32, %v1028_v45  ;;  %v1151_v45 = vld [vmem:[%s2709_s8] sm:$0xff] }
 0x268   : > { %v1920_v47 = vpop.eup %1919  ;;  %v1030_v48 = vmul.f32 1.442695, %v1029_v46  ;;  %v1908_v46 = vld [vmem:[%s2712_s11] ss:$0 sm:$0xff] }
 0x269   : > { %v1922_v49 = vpop.eup %1921  ;;  %v898_v50 = vsel %vm798_vm1, %v1920_v47, 0.0 }
 0x26a   : > { %1923 = vpow2.f32 %v1030_v48  ;;  %899 = vadd.xlane.f32.xlu2 %v898_v50  ;;  %v965_v51 = vsel %vm798_vm1, %v1922_v49, 0.0 }
 0x26b   : > { %966 = vadd.xlane.f32.xlu1 %v965_v51 }
 0x270   : > { %v1924_v52 = vpop.eup %1923  ;;  %v837_v53 = vpop.permute.xlu0 %836 }
 0x271   : > { %857 = vmatpush.msra.mxu2 %v837_v53  ;;  %v1032_v54 = vsel %vm798_vm1, %v1924_v52, 0.0 }
 0x272   : > { %1033 = vadd.xlane.f32.xlu2 %v1032_v54 }
 0x278   : > { %v1038_v3 = vpop.permute.xlu0 %1037 }
 0x284   : > { %903 = vrot.lane.b32.xlu1 %v2411_v7, %s2135_s16 }
 0x28a   : > { %970 = vrot.lane.b32.xlu2 %v2411_v7, %s2136_s19  ;;  %s2786_s19 = sld [smem:[#allocation28_spill]] }
 0x2d5   : > { %v833_v55 = vpop.xlane.xlu1 %832 }
 0x2d6   : > { %1925 = vrcp.f32 %v833_v55 }
 0x2dc   : > { %v1926_v56 = vpop.eup %1925 }
 0x2dd   : > { %v900_v57 = vpop.xlane.xlu2 %899  ;;  %v835_v58 = vmul.f32 %v1926_v56, %v1918_v41 }
 0x2de   : > { %v967_v59 = vpop.xlane.xlu1 %966 }
 0x2df   : > { %1794 = vmatmul.msk.f32.vlgmr.msra.gmra.mxu2 %vm798_vm1, %v835_v58  ;;  %1927 = vrcp.f32 %v967_v59  ;;  %v1906_v58 = vld [vmem:[%s2779_s4] ss:$0 sm:$0xff] }
 0x2e0   : > { %1929 = vrcp.f32 %v900_v57 }
 0x2e5   : > { %v1034_v60 = vpop.xlane.xlu2 %1033  ;;  %v1928_v61 = vpop.eup %1927 }
 0x2e6   : > { %v969_v63 = vmul.f32 %v1928_v61, %v1922_v49  ;;  %v1930_v0 = vpop.eup %1929  ;;  %1931 = vrcp.f32 %v1034_v60  ;;  %v1907_v61 = vld [vmem:[%s2708_s7] ss:$0 sm:$0xff] }
 0x2e7   : > { %v902_v2 = vmul.f32 %v1930_v0, %v1920_v47  ;;  %1933 = vrcp.f32 %v2140_v26 }
 0x2ec   : > { %v1932_v5 = vpop.eup %1931 }
 0x2ed   : > { %v971_v62 = vpop.permute.xlu2 %970  ;;  %v1036_v6 = vmul.f32 %v1932_v5, %v1924_v52  ;;  %v1934_v30 = vpop.eup %1933 }
 0x2ee   : > { %991 = vmatpush.msra.mxu3 %v971_v62  ;;  %v1118_v32 = vmul.f32 32.0, %v1934_v30  ;;  %vm1122_vm5 = vweird.f32 %v1934_v30 }
 0x2ef   : > { %1800 = vmatmul.msk.f32.vlgmr.msra.gmra.mxu3 %vm798_vm1, %v969_v63 }
 0x2f0   : > { %v1119_v33 = vsub.f32 1.0, %v1118_v32 }
 0x2f2   : > { %v1120_v34 = vmul.f32 %v1934_v30, %v1119_v33 }
 0x2f4   : > { %v1121_v35 = vadd.f32 %v1934_v30, %v1120_v34 }
 0x2f6   : > { %v904_v1 = vpop.permute.xlu1 %903  ;;  %v2495_v36 = vsel %vm1122_vm5, %v1934_v30, %v1121_v35 }
 0x2f7   : > { %924 = vmatpush.msrb.mxu2 %v904_v1 }
 0x2f8   : > { %1797 = vmatmul.msk.f32.vlgmr.msrb.gmra.mxu2 %vm798_vm1, %v902_v2  ;;  %v1909_v2 = vld [vmem:[%s2710_s9] ss:$0 sm:$0xff] }
 0x2f9   : > { %1058 = vmatpush.msra.mxu2 %v1038_v3 }
 0x2fb   : > { %1174 = vmatpush.msrb.mxu2 %v1154_v42 }
 0x2fd   : > { %1175 = vmatpush.msrb.mxu2 %v1153_v43 }
 0x2ff   : > { %1176 = vmatpush.msrb.mxu2 %v1152_v44 }
 0x300   : > { %1803 = vmatmul.msk.f32.vlgmr.msra.gmra.mxu2 %vm798_vm1, %v1036_v6 }
 0x301   : > { %1177 = vmatpush.msrb.mxu2 %v1151_v45 }
 0x362   : > { %v859_v8 = vpop.f32.mrf.mxu2 }
 0x372   : > { %v993_v7 = vpop.f32.mrf.mxu3 }
 0x373   : > { %1068 = vrot.lane.b32.xlu1 %v993_v7, %s2740_s23  ;;  %s1673_s23 = sshll.u32 %s755_s1, 4  ;;  %s1674_s23 = int_to_ptr.vmem [resolvable:$true] %s1673_s23 }
 0x37b   : > { %v926_v9 = vpop.f32.mrf.mxu2 }
 0x37c   : > { %1064 = vrot.lane.b32.xlu0 %v926_v9, %s2739_s27  ;;  %s2785_s27 = sld [smem:[#allocation27_spill]] }
 0x383   : > { %v1060_v10 = vpop.f32.mrf.mxu2 }
 0x384   : > { %1072 = vrot.lane.b32.xlu0 %v1060_v10, %s2741_s22  ;;  %s2787_s22 = sld [smem:[#allocation30_spill]] }
 0x3e5   : > { %v1069_v17 = vpop.permute.xlu1 %1068 }
 0x3ee   : > { %v1065_v15 = vpop.permute.xlu0 %1064 }
 0x3ef   : > { %v1075_v16 = vsel %vm798_vm1, %v859_v8, %v1065_v15 }
 0x3f0   : > { %v1077_v18 = vsel %vm1076_vm3, %v1075_v16, %v1069_v17 }
 0x3f6   : > { %v1073_v19 = vpop.permute.xlu0 %1072 }
 0x3f7   : > { %v1079_v20 = vsel %vm1078_vm4, %v1077_v18, %v1073_v19 }
 0x3f8   : > { %1804 = vmatmul.msk.f32.vlgmr.msra.gmra.mxu1 %vm771_vm0, %v1079_v20 }
 0x475   : > { %v1108_v22 = vpop.f32.mrf.mxu1 }
 0x476   : > { %v1109_v23 = vadd.f32 %v1905_v21, %v1108_v22 }
 0x478   : > { %v1111_v24 = vadd.f32 %v1109_v23, %v2404_v4  ;;  %v1182_v4 = vld [vmem:[%s2711_s10] sm:$0xff] }
 0x479   : > { %1208 = vmatpush.msrb.mxu0 %v1182_v4 }
 0x47a   : > { %v1114_v25 = vsel %vm771_vm0, %v1111_v24, 0.0  ;;  %1806 = vmatmul.msk.f32.vlgmr.msrb.gmra.mxu0 %vm771_vm0, %v757_v31 }
 0x47b   : > { %1115 = vadd.xlane.f32.xlu2 %v1114_v25 }
 0x4ee   : > { %v1116_v37 = vpop.xlane.xlu2 %1115 }
 0x4ef   : > { %v1124_v38 = vmul.f32 %v2495_v36, %v1116_v37 }
 0x4f1   : > { %v1125_v39 = vsub.f32 %v1111_v24, %v1124_v38 }
 0x4f3   : > { %v1126_v40 = vmul.f32 %v1125_v39, %v1125_v39 }
 0x4f5   : > { %v1127_v41 = vsel %vm771_vm0, %v1126_v40, 0.0 }
 0x4f6   : > { %1128 = vadd.xlane.f32.xlu1 %v1127_v41 }
 0x4f7   : > { %v1210_v47 = vpop.f32.mrf.mxu0 }
 0x4f8   : > { %v2514_v48 = vadd.f32 %v1908_v46, %v1210_v47 }
 0x4fa   : > { %1279 = vrot.lane.b32.xlu0 %v2514_v48, %s2127_s20  ;;  %1807 = vmatpush.xpose.msk.msra.mxu2 %vm798_vm1, %v2514_v48 }
 0x502   : > { %1345 = vrot.lane.b32.xlu0 %v2514_v48, %s2129_s30 }
 0x50a   : > { %1411 = vrot.lane.b32.xlu0 %v2514_v48, %s2132_s24 }
 0x569   : > { %v1129_v49 = vpop.xlane.xlu1 %1128 }
 0x56a   : > { %v1130_v50 = vmul.f32 %v1129_v49, %v2495_v36 }
 0x56c   : > { %v1131_v51 = vadd.f32 1e-05, %v1130_v50  ;;  %v1280_v0 = vpop.permute.xlu0 %1279 }
 0x56d   : > { %1810 = vmatpush.xpose.msk.msrb.mxu3 %vm798_vm1, %v1280_v0  ;;  %v1492_v0 = vld [vmem:[%s2713_s12 + $0x10] sm:$0xff] }
 0x56e   : > { %1935 = vrsqrt.f32 %v1131_v51  ;;  %vm1138_vm7 = vweird.f32 %v1131_v51 }
 0x574   : > { %v1936_v52 = vpop.eup %1935  ;;  %v1346_v1 = vpop.permute.xlu0 %1345 }
 0x575   : > { %v1133_v53 = vmul.f32 %v1936_v52, %v1131_v51  ;;  %vm1139_vm6 = vweird.f32 %v1936_v52 }
 0x576   : > { %vm1140_vm8 = vmor %vm1138_vm7, %vm1139_vm6 }
 0x577   : > { %v1134_v54 = vmul.f32 %v1936_v52, %v1133_v53 }
 0x579   : > { %v1135_v55 = vmul.f32 0.5, %v1134_v54 }
 0x57b   : > { %v1136_v56 = vsub.f32 1.5, %v1135_v55 }
 0x57c   : > { %v1412_v6 = vpop.permute.xlu0 %1411 }
 0x57d   : > { %v1137_v57 = vmul.f32 %v1936_v52, %v1136_v56  ;;  %1816 = vmatpush.xpose.msk.msra.mxu3 %vm798_vm1, %v1412_v6 }
 0x57f   : > { %v1141_v59 = vsel %vm1140_vm8, %v1936_v52, %v1137_v57 }
 0x580   : > { %v1142_v60 = vmul.f32 %v1141_v59, %v1125_v39 }
 0x582   : > { %v1146_v62 = vmul.f32 %v1906_v58, %v1142_v60 }
 0x584   : > { %v2531_v63 = vadd.f32 %v1907_v61, %v1146_v62  ;;  %v1493_v62 = vld [vmem:[%s2713_s12 + $0x18] sm:$0xff] }
 0x586   : > { %1805 = vmatmul.msk.f32.vlgmr.msrb.gmra.mxu2 %vm771_vm0, %v2531_v63 }
 0x587   : > { %1813 = vmatpush.xpose.msk.msrb.mxu2 %vm798_vm1, %v1346_v1  ;;  %v1491_v1 = vld [vmem:[%s2713_s12 + $0x8] sm:$0xff] }
 0x609   : > { %v1179_v3 = vpop.f32.mrf.mxu2 }
 0x60a   : > { %v1180_v5 = vadd.f32 %v1909_v2, %v1179_v3  ;;  %v1490_v2 = vld [vmem:[%s2713_s12] sm:$0xff] }
 0x60c   : > { %1409 = vrot.lane.b32.xlu2 %v1180_v5, %s2132_s24  ;;  %1277 = vrot.lane.b32.xlu0 %v1180_v5, %s2127_s20  ;;  %s2780_s20 = smov 88  }
 0x60d   : > { %1808 = vmatmul.msk.f32.vlgmr.msra.gmra.mxu2 %vm798_vm1, %v1180_v5 }
 0x60e   : > { %1513 = vmatpush.msra.mxu2 %v1493_v62 }
 0x610   : > { %1514 = vmatpush.msra.mxu2 %v1492_v0 }
 0x612   : > { %1515 = vmatpush.msra.mxu2 %v1491_v1 }
 0x614   : > { %1343 = vrot.lane.b32.xlu0 %v1180_v5, %s2129_s30  ;;  %s2783_s30 = smov 24   ;;  %1516 = vmatpush.msra.mxu2 %v1490_v2 }
 0x666   : > { %v1410_v8 = vpop.permute.xlu2 %1409 }
 0x67e   : > { %v1278_v7 = vpop.permute.xlu0 %1277 }
 0x67f   : > { %1811 = vmatmul.msk.f32.vlgmr.msrb.gmra.mxu3 %vm798_vm1, %v1278_v7 }
 0x686   : > { %v1344_v9 = vpop.permute.xlu0 %1343 }
 0x687   : > { %1814 = vmatmul.msk.f32.vlgmr.msrb.gmra.mxu2 %vm798_vm1, %v1344_v9  ;;  %1817 = vmatmul.msk.f32.vlgmr.msra.gmra.mxu3 %vm798_vm1, %v1410_v8 }
 0x690   : > { %v1236_v10 = vpop.f32.mrf.mxu2 }
 0x691   : > { %v1239_v11 = vmul.f32 0.35355338, %v1236_v10  ;;  %v1910_v10 = vld [vmem:[%s2714_s13] ss:$0 sm:$0xff] }
 0x693   : > { %v1240_v12 = vsel %vm798_vm1, %v1239_v11, -inf }
 0x694   : > { %1241 = vmax.xlane.f32.xlu1 %v1240_v12 }
 0x702   : > { %v1302_v13 = vpop.f32.mrf.mxu3 }
 0x703   : > { %v1305_v14 = vmul.f32 0.35355338, %v1302_v13 }
 0x705   : > { %v1306_v15 = vsel %vm798_vm1, %v1305_v14, -inf }
 0x706   : > { %1307 = vmax.xlane.f32.xlu0 %v1306_v15 }
 0x707   : > { %v1242_v16 = vpop.xlane.xlu1 %1241 }
 0x708   : > { %v1243_v17 = vsub.f32 %v1239_v11, %v1242_v16 }
 0x70a   : > { %v1244_v18 = vmul.f32 1.442695, %v1243_v17  ;;  %v1368_v19 = vpop.f32.mrf.mxu2  ;;  %v1434_v22 = vpop.f32.mrf.mxu3 }
 0x70b   : > { %v1371_v20 = vmul.f32 0.35355338, %v1368_v19  ;;  %v1437_v23 = vmul.f32 0.35355338, %v1434_v22  ;;  %v1555_v22 = vld [vmem:[#allocation7 + $0x8] sm:$0xff] }
 0x70c   : > { %1937 = vpow2.f32 %v1244_v18 }
 0x70d   : > { %v1372_v21 = vsel %vm798_vm1, %v1371_v20, -inf  ;;  %v1438_v26 = vsel %vm798_vm1, %v1437_v23, -inf }
 0x70e   : > { %1373 = vmax.xlane.f32.xlu1 %v1372_v21  ;;  %v1556_v21 = vld [vmem:[#allocation7 + $0x10] sm:$0xff] }
 0x712   : > { %v1938_v24 = vpop.eup %1937 }
 0x713   : > { %v1246_v25 = vsel %vm798_vm1, %v1938_v24, 0.0 }
 0x714   : > { %1247 = vadd.xlane.f32.xlu2 %v1246_v25 }
 0x716   : > { %1439 = vmax.xlane.f32.xlu1 %v1438_v26 }
 0x72c   : > { %1383 = vrot.lane.b32.xlu2 %v2514_v48, %s2130_s5  ;;  %s2790_s5 = sld [smem:[#allocation35_spill]] }
 0x72f   : > { %1251 = vrot.lane.b32.xlu1 %v2514_v48, %s2128_s26  ;;  %s2782_s26 = smov 8  }
 0x732   : > { %s1671_s24 = scalar_lea.hbm %s2790_s5, %s1822_s0  ;;  %s2067_s18 = scalar_lea.hbm %s2790_s5, 16 }
 0x733   : > { %s1675_s4 = sshll.u32 %s1671_s24, 4  ;;  %s1676_s4 = int_to_ptr.hbm [resolvable:$true] %s1675_s4 }
 0x734   : > { %s2061_s16 = sshra.s32 %s1676_s4, 4  ;;  %s2062_s16 = int_to_ptr.hbm [resolvable:$true] %s2061_s16 }
 0x735   : > { %s2063_s0 = scalar_lea.hbm %s2062_s16, 8  ;;  %p2068_p7 = scmp.lt.s32.totalorder %s2062_s16, %s2790_s5 }
 0x736   : > { %p2064_p1 = scmp.ne.s32.totalorder %s2062_s16, %s2063_s0  ;;  %p2069_p9 = scmp.lt.s32.totalorder %s2067_s18, %s2063_s0 }
 0x738   : > { %p2065_p3 = pnand %p2064_p1, %p2320_p0  ;;  %p2070_p8 = por %p2069_p9, %p2068_p7 }
 0x73a   : > { %p2066_p13 = pneg %p2065_p3 }
 0x73c   : > { %p2071_p10 = pnand %p2070_p8, %p2066_p13 }
 0x779   : > { %v1308_v27 = vpop.xlane.xlu0 %1307 }
 0x77a   : > { %v1309_v28 = vsub.f32 %v1305_v14, %v1308_v27 }
 0x77c   : > { %v1310_v29 = vmul.f32 1.442695, %v1309_v28 }
 0x77e   : > { %1939 = vpow2.f32 %v1310_v29 }
 0x781   : > { %v1374_v30 = vpop.xlane.xlu1 %1373 }
 0x782   : > { %v1375_v4 = vsub.f32 %v1371_v20, %v1374_v30  ;;  %v1557_v20 = vld [vmem:[#allocation7 + $0x18] sm:$0xff] }
 0x784   : > { %v1940_v31 = vpop.eup %1939  ;;  %v1376_v32 = vmul.f32 1.442695, %v1375_v4 }
 0x785   : > { %v1312_v33 = vsel %vm798_vm1, %v1940_v31, 0.0 }
 0x786   : > { %1941 = vpow2.f32 %v1376_v32  ;;  %1313 = vadd.xlane.f32.xlu1 %v1312_v33 }
 0x787   : > { %v1248_v41 = vpop.xlane.xlu2 %1247 }
 0x789   : > { %v1440_v34 = vpop.xlane.xlu1 %1439 }
 0x78a   : > { %v1441_v35 = vsub.f32 %v1437_v23, %v1440_v34  ;;  %v1554_v23 = vld [vmem:[#allocation7] sm:$0xff] }
 0x78c   : > { %v1942_v37 = vpop.eup %1941  ;;  %v1442_v38 = vmul.f32 1.442695, %v1441_v35 }
 0x78d   : > { %v1378_v39 = vsel %vm798_vm1, %v1942_v37, 0.0 }
 0x78e   : > { %1943 = vpow2.f32 %v1442_v38  ;;  %1379 = vadd.xlane.f32.xlu1 %v1378_v39 }
 0x78f   : > { %1945 = vrcp.f32 %v1248_v41  ;;  %v1384_v46 = vpop.permute.xlu2 %1383 }
 0x794   : > { %v1944_v40 = vpop.eup %1943 }
 0x795   : > { %v1444_v42 = vsel %vm798_vm1, %v1944_v40, 0.0  ;;  %v1946_v43 = vpop.eup %1945 }
 0x796   : > { %1445 = vadd.xlane.f32.xlu0 %v1444_v42  ;;  %v1250_v44 = vmul.f32 %v1946_v43, %v1938_v24 }
 0x7a1   : > { %v1252_v45 = vpop.permute.xlu1 %1251 }
 0x7a2   : > { %1272 = vmatpush.msrb.mxu1 %v1252_v45  ;;  %v1911_v45 = vld [vmem:[%s2785_s27] ss:$0 sm:$0xff]  ;;  %s2788_s27 = sld [smem:[#allocation32_spill]] }
 0x7a3   : > { %1809 = vmatmul.msk.f32.vlgmr.msrb.gmra.mxu1 %vm798_vm1, %v1250_v44 }
 0x7a4   : > { %1404 = vmatpush.msra.mxu1 %v1384_v46 }
 0x7a6   : > { %1577 = vmatpush.msrb.mxu1 %v1557_v20 }
 0x7a7   : > { %1449 = vrot.lane.b32.xlu1 %v2514_v48, %s2126_s17  ;;  %s2781_s17 = smov 16  }
 0x7a8   : > { %1578 = vmatpush.msrb.mxu1 %v1556_v21 }
 0x7aa   : > { %1317 = vrot.lane.b32.xlu0 %v2514_v48, %s2780_s20  ;;  %1579 = vmatpush.msrb.mxu1 %v1555_v22  ;;  %s2784_s20 = sld [smem:[#allocation31_spill]] }
 0x7ac   : > { %1580 = vmatpush.msrb.mxu1 %v1554_v23 }
 0x7b0   : > { %v1600_v24 = vld [vmem:[%s2784_s20 + $0x70] sm:$0xff]  ;;  %v1599_v25 = vld [vmem:[%s2784_s20 + $0x68] sm:$0xff]  ;;  %v1598_v28 = vld [vmem:[%s2784_s20 + $0x60] sm:$0xff] }
 0x7b1   : > { %v1597_v30 = vld [vmem:[%s2784_s20 + $0x58] sm:$0xff]  ;;  %v1596_v4 = vld [vmem:[%s2784_s20 + $0x50] sm:$0xff]  ;;  %v1594_v32 = vld [vmem:[%s2784_s20 + $0x40] sm:$0xff] }
 0x7b2   : > { %v1593_v34 = vld [vmem:[%s2784_s20 + $0x38] sm:$0xff]  ;;  %v1591_v39 = vld [vmem:[%s2784_s20 + $0x28] sm:$0xff]  ;;  %v1590_v41 = vld [vmem:[%s2784_s20 + $0x20] sm:$0xff] }
 0x7b3   : > { %v1589_v43 = vld [vmem:[%s2784_s20 + $0x18] sm:$0xff] }
 0x7f9   : > { %v1314_v47 = vpop.xlane.xlu1 %1313 }
 0x801   : > { %v1380_v49 = vpop.xlane.xlu1 %1379 }
 0x802   : > { %1947 = vrcp.f32 %v1380_v49  ;;  %v1912_v49 = vld [vmem:[%s2786_s19] ss:$0 sm:$0xff] }
 0x803   : > { %1949 = vrcp.f32 %v1314_v47 }
 0x808   : > { %v1948_v50 = vpop.eup %1947 }
 0x809   : > { %v1382_v51 = vmul.f32 %v1948_v50, %v1942_v37  ;;  %v1446_v52 = vpop.xlane.xlu0 %1445  ;;  %v1950_v53 = vpop.eup %1949  ;;  %v1592_v37 = vld [vmem:[%s2784_s20 + $0x30] sm:$0xff] }
 0x80a   : > { %1951 = vrcp.f32 %v1446_v52  ;;  %v1316_v54 = vmul.f32 %v1950_v53, %v1940_v31  ;;  %v1595_v31 = vld [vmem:[%s2784_s20 + $0x48] sm:$0xff]  ;;  %v1588_v52 = vld [vmem:[%s2784_s20 + $0x10] sm:$0xff] }
 0x80b   : > { %1815 = vmatmul.msk.f32.vlgmr.msra.gmra.mxu1 %vm798_vm1, %v1382_v51  ;;  %v1587_v53 = vld [vmem:[%s2784_s20 + $0x8] sm:$0xff] }
 0x810   : > { %v1952_v57 = vpop.eup %1951 }
 0x811   : > { %v1448_v48 = vmul.f32 %v1952_v57, %v1944_v40 }
 0x819   : > { %v1450_v56 = vpop.permute.xlu1 %1449 }
 0x81c   : > { %v1318_v55 = vpop.permute.xlu0 %1317 }
 0x81d   : > { %1338 = vmatpush.msra.mxu0 %v1318_v55  ;;  %v1913_v55 = vld [vmem:[%s2787_s22] ss:$0 sm:$0xff]  ;;  %s2792_s22 = sld [smem:[#allocation34_spill]] }
 0x81e   : > { %1812 = vmatmul.msk.f32.vlgmr.msra.gmra.mxu0 %vm798_vm1, %v1316_v54  ;;  %v1586_v54 = vld [vmem:[%s2784_s20] sm:$0xff] }
 0x81f   : > { %1470 = vmatpush.msrb.mxu0 %v1450_v56 }
 0x820   : > { %v1274_v58 = vpop.f32.mrf.mxu1 }
 0x826   : > { %1818 = vmatmul.msk.f32.vlgmr.msrb.gmra.mxu0 %vm798_vm1, %v1448_v48 }
 0x888   : > { %v1406_v59 = vpop.f32.mrf.mxu1 }
 0x889   : > { %1480 = vrot.lane.b32.xlu1 %v1406_v59, %s2781_s17  ;;  %s2789_s17 = sld [smem:[#allocation33_spill]] }
 0x89b   : > { %v1340_v60 = vpop.f32.mrf.mxu0 }
 0x89c   : > { %1476 = vrot.lane.b32.xlu0 %v1340_v60, %s2782_s26 }
 0x8a3   : > { %v1472_v61 = vpop.f32.mrf.mxu0 }
 0x8a4   : > { %1484 = vrot.lane.b32.xlu0 %v1472_v61, %s2783_s30 }
 0x8fb   : > { %v1481_v6 = vpop.permute.xlu1 %1480 }
 0x90e   : > { %v1477_v3 = vpop.permute.xlu0 %1476 }
 0x90f   : > { %v1487_v5 = vsel %vm798_vm1, %v1274_v58, %v1477_v3  ;;  %v1914_v58 = vld [vmem:[%s2788_s27] ss:$0 sm:$0xff]  ;;  %s1661_s27 = scalar_lea.sflag [#allocation4], %s2371_s14 }
 0x910   : > { %v1488_v7 = vsel %vm1076_vm3, %v1487_v5, %v1481_v6 }
 0x916   : > { %v1485_v8 = vpop.permute.xlu0 %1484 }
 0x917   : > { %v1489_v9 = vsel %vm1078_vm4, %v1488_v7, %v1485_v8 }
 0x918   : > { %1819 = vmatmul.msk.f32.vlgmr.msra.gmra.mxu2 %vm771_vm0, %v1489_v9 }
 0x99b   : > { %v1518_v11 = vpop.f32.mrf.mxu2 }
 0x99c   : > { %v1519_v12 = vadd.f32 %v1910_v10, %v1518_v11 }
 0x99e   : > { %v1521_v13 = vadd.f32 %v1519_v12, %v2531_v63  ;;  %v1601_v63 = vld [vmem:[%s2784_s20 + $0x78] sm:$0xff] }
 0x99f   : > { %1606 = vmatpush.msrb.mxu3 %v1601_v63 }
 0x9a0   : > { %v1524_v14 = vsel %vm771_vm0, %v1521_v13, 0.0 }
 0x9a1   : > { %1525 = vadd.xlane.f32.xlu1 %v1524_v14  ;;  %1607 = vmatpush.msrb.mxu3 %v1600_v24 }
 0x9a3   : > { %1608 = vmatpush.msrb.mxu3 %v1599_v25 }
 0x9a5   : > { %1609 = vmatpush.msrb.mxu3 %v1598_v28 }
 0x9a7   : > { %1610 = vmatpush.msrb.mxu3 %v1597_v30 }
 0x9a9   : > { %1611 = vmatpush.msrb.mxu3 %v1596_v4 }
 0x9ab   : > { %1612 = vmatpush.msrb.mxu3 %v1595_v31 }
 0x9ad   : > { %1613 = vmatpush.msrb.mxu3 %v1594_v32 }
 0x9af   : > { %1614 = vmatpush.msrb.mxu3 %v1593_v34 }
 0x9b1   : > { %1615 = vmatpush.msrb.mxu3 %v1592_v37 }
 0x9b3   : > { %1616 = vmatpush.msrb.mxu3 %v1591_v39 }
 0x9b5   : > { %1617 = vmatpush.msrb.mxu3 %v1590_v41 }
 0x9b7   : > { %1618 = vmatpush.msrb.mxu3 %v1589_v43 }
 0x9b9   : > { %1619 = vmatpush.msrb.mxu3 %v1588_v52 }
 0x9bb   : > { %1620 = vmatpush.msrb.mxu3 %v1587_v53 }
 0x9bd   : > { %1621 = vmatpush.msrb.mxu3 %v1586_v54 }
 0xa14   : > { %v1526_v15 = vpop.xlane.xlu1 %1525 }
 0xa15   : > { %v1527_v16 = vmul.f32 %v1526_v15, %v2495_v36  ;;  %v1915_v15 = vld [vmem:[%s2789_s17] ss:$0 sm:$0xff] }
 0xa17   : > { %v1528_v17 = vsub.f32 %v1521_v13, %v1527_v16 }
 0xa19   : > { %v1529_v18 = vmul.f32 %v1528_v17, %v1528_v17 }
 0xa1b   : > { %v1530_v19 = vsel %vm771_vm0, %v1529_v18, 0.0 }
 0xa1c   : > { %1531 = vadd.xlane.f32.xlu2 %v1530_v19 }
 0xa8f   : > { %v1532_v26 = vpop.xlane.xlu2 %1531 }
 0xa90   : > { %v1533_v27 = vmul.f32 %v1532_v26, %v2495_v36 }
 0xa92   : > { %v1534_v29 = vadd.f32 1e-05, %v1533_v27 }
 0xa94   : > { %1953 = vrsqrt.f32 %v1534_v29  ;;  %vm1541_vm10 = vweird.f32 %v1534_v29 }
 0xa9a   : > { %v1954_v33 = vpop.eup %1953 }
 0xa9b   : > { %v1536_v35 = vmul.f32 %v1954_v33, %v1534_v29  ;;  %vm1542_vm9 = vweird.f32 %v1954_v33 }
 0xa9c   : > { %vm1543_vm11 = vmor %vm1541_vm10, %vm1542_vm9 }
 0xa9d   : > { %v1537_v38 = vmul.f32 %v1954_v33, %v1536_v35 }
 0xa9f   : > { %v1538_v40 = vmul.f32 0.5, %v1537_v38 }
 0xaa1   : > { %v1539_v42 = vsub.f32 1.5, %v1538_v40 }
 0xaa3   : > { %v1540_v44 = vmul.f32 %v1954_v33, %v1539_v42 }
 0xaa5   : > { %v1544_v46 = vsel %vm1543_vm11, %v1954_v33, %v1540_v44 }
 0xaa6   : > { %v1545_v47 = vmul.f32 %v1544_v46, %v1528_v17  ;;  %v1916_v17 = vld [vmem:[%s2792_s22] ss:$0 sm:$0xff] }
 0xaa8   : > { %v1549_v50 = vmul.f32 %v1911_v45, %v1545_v47 }
 0xaaa   : > { %v1553_v51 = vadd.f32 %v1912_v49, %v1549_v50 }
 0xaac   : > { %1820 = vmatmul.msk.f32.vlgmr.msrb.gmra.mxu1 %vm771_vm0, %v1553_v51 }
 0xb29   : > { %v1582_v56 = vpop.f32.mrf.mxu1 }
 0xb2a   : > { %v1583_v57 = vadd.f32 %v1913_v55, %v1582_v56 }
 0xb2c   : > { %v1585_v48 = vmax.f32 %v1583_v57, 0.0 }
 0xb2e   : > { %1622 = vmatmul.f32.vlgmr.msrb.gmra.mxu3 %v1585_v48 }
 0xbb1   : > { %v1623_v59 = vpop.f32.mrf.mxu3 }
 0xbb2   : > { %v1624_v60 = vadd.f32 %v1914_v58, %v1623_v59 }
 0xbb4   : > { %v1626_v61 = vadd.f32 %v1624_v60, %v1553_v51 }
 0xbb6   : > { %v1629_v62 = vsel %vm771_vm0, %v1626_v61, 0.0 }
 0xbb7   : > { %1630 = vadd.xlane.f32.xlu0 %v1629_v62 }
 0xc2a   : > { %v1631_v0 = vpop.xlane.xlu0 %1630 }
 0xc2b   : > { %v1632_v1 = vmul.f32 %v1631_v0, %v2495_v36 }
 0xc2d   : > { %v1633_v2 = vsub.f32 %v1626_v61, %v1632_v1 }
 0xc2f   : > { %v1634_v3 = vmul.f32 %v1633_v2, %v1633_v2 }
 0xc31   : > { %v1635_v5 = vsel %vm771_vm0, %v1634_v3, 0.0 }
 0xc32   : > { %1636 = vadd.xlane.f32.xlu1 %v1635_v5 }
 0xca5   : > { %v1637_v6 = vpop.xlane.xlu1 %1636 }
 0xca6   : > { %v1638_v7 = vmul.f32 %v1637_v6, %v2495_v36 }
 0xca8   : > { %v1639_v8 = vadd.f32 1e-05, %v1638_v7 }
 0xcaa   : > { %1955 = vrsqrt.f32 %v1639_v8  ;;  %vm1646_vm13 = vweird.f32 %v1639_v8 }
 0xcb0   : > { %v1956_v9 = vpop.eup %1955 }
 0xcb1   : > { %v1641_v10 = vmul.f32 %v1956_v9, %v1639_v8  ;;  %vm1647_vm12 = vweird.f32 %v1956_v9 }
 0xcb2   : > { %vm1648_vm14 = vmor %vm1646_vm13, %vm1647_vm12 }
 0xcb3   : > { %v1642_v11 = vmul.f32 %v1956_v9, %v1641_v10 }
 0xcb5   : > { %v1643_v12 = vmul.f32 0.5, %v1642_v11 }
 0xcb7   : > { %v1644_v13 = vsub.f32 1.5, %v1643_v12 }
 0xcb9   : > { %v1645_v14 = vmul.f32 %v1956_v9, %v1644_v13 }
 0xcbb   : > { %v1649_v36 = vsel %vm1648_vm14, %v1956_v9, %v1645_v14 }
 0xcbc   : > { %v1650_v16 = vmul.f32 %v1649_v36, %v1633_v2 }
 0xcbe   : > { %v1654_v18 = vmul.f32 %v1915_v15, %v1650_v16 }
 0xcc0   : > { %v1658_v19 = vadd.f32 %v1916_v17, %v1654_v18 }
 0xcc2   : > { %1659 = vst.msk [vmem:[%s755_s1] sm:$0xff] %vm771_vm0, %v1658_v19 }
 0xcc3   : > { %2074 = shalt.err (!%p2071_p10)
}
 0xcc4   : > { %1833 = dma.vmem_to_hbm [thread:$0]  (%p2320_p0), %s1674_s23, 128, %s1676_s4, %s1661_s27  }
 0xcc5 PF: > { %s2793_s14 = sld [smem:[#allocation13_spill]] }
 0xcc6   : > { %s2795_s3 = sld [smem:[#allocation15_spill]] }
 0xccb   : > { %s1687_s29 = sand.u32 1, %s2793_s14  }
 0xccc   : > { %p2796_p12 = scmp.ge.s32.totalorder %s2795_s3, 2  ;;  %s1688_s22 = scalar_lea.sflag [#allocation4], %s1687_s29 }
 0xcce   : > { %p1847_p5 = pnand %p2796_p12, %p2326_p6 }
 0xcd0   : > { %p1848_p11 = pneg %p1847_p5 }
 0xcd2   : > { %2104 = dma.done.wait (%p1848_p11), %s1688_s22, 128  }
 0xcd3   : > { %2106 = vsyncadd (%p1848_p11), %s1688_s22, 4294967168  ;;  %s2797_s30 = sld [smem:[#allocation16_spill]]  ;;  %s2800_s3 = smov %s2113_s28 }
 0xcd4   : > { %s2798_s1 = sld [smem:[#allocation14_spill]] }
 0xcd5   : > { %s2799_s29 = sld [smem:[#allocation17_spill]] }
 0xcd9   : > { %p38_p2 = scmp.ge.s32.totalorder %s2797_s30, 4  }
 0xcda   : > { %s2801_s28 = smov %s2798_s1 }
 0xcdb   :  { %40 = sbr.rel (!%p38_p2) target bundleno = 24 (0x18), region = 170 }
 0xce0   :  { %1694 = vsyncpa [#allocation3], 1 }
 0xce1   :  { %1696 = vsyncpa [#allocation3 + $0x1], 1 }
 0xce2   :  { %1697 = vsyncpa [#allocation6], 1 }
 0xce3   :  { %1699 = vsyncpa [#allocation6 + $0x1], 1 }
 0xce4   :  { %1700 = vsyncpa [#allocation4], 1 }
 0xce5   :  { %1702 = vsyncpa [#allocation4 + $0x1], 1 }

</bundles_post_ra>
